<compile_context>
chip_gen: v6e
topology: v6e:2x2x1
jax: 0.10.0
libtpu: 0.0.40
codegen_flags: <defaults>
</compile_context>

<pallas_src>
import numpy as np
import jax
import jax.numpy as jnp
from jax.experimental import pallas as pl
from jax.experimental.pallas import tpu as pltpu

# Problem sizes (small, consistent with the module's forward)
VOC = 20        # voc_size
K_TAGS = 5      # tags_size
EMB = 16        # emb_size
HID = 32        # hidden_size (BiLSTM output); per-direction H = 16
B, T = 2, 8     # real batch, sequence length
H = HID // 2
BP = 8          # batch padded to one sublane tile
TBP = T * BP    # 64 time-major rows


def bilstm_crf_kernel(
    emb_ref,      # (T*BP, 2E) f32   row t*BP+b = [emb[t,b], emb[T-1-t,b]] (0 for padded b)
    tags_ref,     # (T*BP, 1)  i32
    mask_ref,     # (T*BP, 1)  f32   0/1, contiguous; 0 everywhere for padded batch rows
    mlast_ref,    # (T*BP, 1)  f32   1.0 at the last valid timestep of each real sequence
    wih_ref,      # (2E, 8H)   block-diag fused input->gate weights
    whh_ref,      # (2H, 8H)   block-diag fused hidden->gate weights
    b_ref,        # (1, 8H)    fused gate bias (b_ih + b_hh per direction)
    wtagf_ref,    # (H, K)     hidden2tag weight, forward-hidden rows
    wtagb_ref,    # (H, K)     hidden2tag weight, backward-hidden rows
    btag_ref,     # (1, K)
    start_ref,    # (1, K)     CRF start transitions
    end_ref,      # (1, K)     CRF end transitions
    trans_ref,    # (K, K)     CRF transitions
    loss_ref,     # (1, 1)     output: -sum(log-likelihood)
):
    K_ = trans_ref.shape[0]
    H_ = wtagf_ref.shape[0]        # per-direction hidden size
    H2 = 2 * H_

    whh = whh_ref[...]
    mask_all = mask_ref[...]       # (T*BP, 1), loaded once
    mlast = mlast_ref[...]

    # ---- BiLSTM: input projection for all timesteps & both directions, one matmul ----
    pre = (jnp.dot(emb_ref[...], wih_ref[...], preferred_element_type=jnp.float32)
           + b_ref[...])                               # (T*BP, 8H)

    # ---- BiLSTM recurrence; ALL state (h, c, per-step outputs) lives in vregs ----
    h_cat = jnp.zeros((BP, H2), jnp.float32)            # [h_fwd | h_bwd]
    c_cat = jnp.zeros((BP, H2), jnp.float32)
    h_fwd = [None] * T
    h_bwd = [None] * T
    for s in range(T):                                  # unrolled
        g = pre[s * BP:(s + 1) * BP, :] + jnp.dot(
            h_cat, whh, preferred_element_type=jnp.float32)          # (BP, 8H) = (8,128)
        # fused gate layout: [i_f,i_b | f_f,f_b | o_f,o_b | g_f,g_b]
        sg = jax.nn.sigmoid(g[:, :6 * H_])              # one contiguous sigmoid slab
        gc = jnp.tanh(g[:, 6 * H_:])                    # one contiguous tanh slab
        ic = sg[:, 0:2 * H_]
        fc = sg[:, 2 * H_:4 * H_]
        oc = sg[:, 4 * H_:6 * H_]
        c_cat = fc * c_cat + ic * gc
        h_cat = oc * jnp.tanh(c_cat)
        h_fwd[s] = h_cat[:, 0:H_]                       # fwd output @ time s
        h_bwd[T - 1 - s] = h_cat[:, H_:H2]              # bwd output @ time T-1-s

    hid_f = jnp.concatenate(h_fwd, axis=0)              # (T*BP, H), time-ordered
    hid_b = jnp.concatenate(h_bwd, axis=0)              # (T*BP, H), time-ordered

    # ---- hidden2tag: two matmuls (fwd/bwd halves), no scratch, no lane concat ----
    emis = (jnp.dot(hid_f, wtagf_ref[...], preferred_element_type=jnp.float32)
            + jnp.dot(hid_b, wtagb_ref[...], preferred_element_type=jnp.float32)
            + btag_ref[...])                            # (T*BP, K)

    # ---- CRF parameters ----
    start_t = start_ref[...]                            # (1, K)
    end_t = end_ref[...]                                # (1, K)
    trans = trans_ref[...]                              # (K, K)

    # ---- gold-path (numerator) score: fully vectorized, no serial loop ----
    k_iota = jax.lax.broadcasted_iota(jnp.int32, (TBP, K_), 1)          # built once
    oh = (k_iota == tags_ref[...]).astype(jnp.float32)                  # (T*BP, K)

    emis_gold = jnp.sum(oh * emis * mask_all, axis=-1, keepdims=True)   # (T*BP, 1)
    start_gold = jnp.sum(oh[0:BP, :] * start_t * mask_all[0:BP, :],
                         axis=-1, keepdims=True)                        # (BP, 1)
    end_gold = jnp.sum(oh * end_t * mlast, axis=-1, keepdims=True)      # (T*BP, 1)
    tr_rows = jnp.dot(oh[0:(T - 1) * BP, :], trans,
                      preferred_element_type=jnp.float32)               # ((T-1)*BP, K)
    tr_gold = (jnp.sum(tr_rows * oh[BP:, :], axis=-1, keepdims=True)
               * mask_all[BP:, :])                                      # ((T-1)*BP, 1)

    numer = (jnp.sum(emis_gold, axis=0, keepdims=True)
             + jnp.sum(start_gold, axis=0, keepdims=True)
             + jnp.sum(end_gold, axis=0, keepdims=True)
             + jnp.sum(tr_gold, axis=0, keepdims=True))                 # (1, 1)

    # ---- log-partition (denominator): forward algorithm — the only serial part ----
    # stable matmul-form logsumexp: shift by row-max of score AND column-max of trans
    cmax = jnp.max(trans, axis=0, keepdims=True)        # (1, K)
    exp_trans = jnp.exp(trans - cmax)                   # (K, K), entries <= 1

    bvalid = mask_all[0:BP, :]                          # 1 for real sequences, 0 for padding
    score = start_t + emis[0:BP, :]                     # (BP, K)  (mask[t=0] == 1 for real rows)
    for t in range(1, T):                               # unrolled, state in registers
        e_t = emis[t * BP:(t + 1) * BP, :]
        m_t = mask_all[t * BP:(t + 1) * BP, :]
        mmax = jnp.max(score, axis=-1, keepdims=True)
        p = jnp.exp(score - mmax)
        nxt = e_t + mmax + cmax + jnp.log(
            jnp.dot(p, exp_trans, preferred_element_type=jnp.float32))
        score = jnp.where(m_t > 0.0, nxt, score)

    final = score + end_t
    fmax = jnp.max(final, axis=-1, keepdims=True)
    denom_b = (fmax + jnp.log(jnp.sum(jnp.exp(final - fmax), axis=-1, keepdims=True))
               ) * bvalid                                # padded rows contribute 0
    denom = jnp.sum(denom_b, axis=0, keepdims=True)     # (1, 1)

    # torchcrf(reduction='sum'):  loss = -(sum_b llh_b) = denom_total - numer_total
    loss_ref[...] = denom - numer


# ----------------------------- one-time wrapper-side packing -----------------------------

def _pack_gate_cols(wf, wb):
    """Block-diagonal fused-gate matrix.

    wf/wb: (rows_f, 4H) / (rows_b, 4H), PyTorch gate column order [i, f, g, o].
    Output: (rows_f + rows_b, 8H) with columns [i_f,i_b | f_f,f_b | o_f,o_b | g_f,g_b]
    so sigmoid applies to one contiguous 6H slab, tanh to one 2H slab, and every
    gate slab lines up with the fused state layout [fwd | bwd].
    """
    rf, rb = wf.shape[0], wb.shape[0]
    Hh = wf.shape[1] // 4
    out = jnp.zeros((rf + rb, 8 * Hh), jnp.float32)
    fwd_dst = (0, 2, 6, 4)   # i_f, f_f, g_f, o_f destinations (in H-blocks)
    bwd_dst = (1, 3, 7, 5)   # i_b, f_b, g_b, o_b
    for src, dst in enumerate(fwd_dst):
        out = out.at[:rf, dst * Hh:(dst + 1) * Hh].set(wf[:, src * Hh:(src + 1) * Hh])
    for src, dst in enumerate(bwd_dst):
        out = out.at[rf:, dst * Hh:(dst + 1) * Hh].set(wb[:, src * Hh:(src + 1) * Hh])
    return out


def _pack_gate_bias(bf, bb):
    Hh = bf.shape[0] // 4
    out = jnp.zeros((8 * Hh,), jnp.float32)
    fwd_dst = (0, 2, 6, 4)
    bwd_dst = (1, 3, 7, 5)
    for src, dst in enumerate(fwd_dst):
        out = out.at[dst * Hh:(dst + 1) * Hh].set(bf[src * Hh:(src + 1) * Hh])
    for src, dst in enumerate(bwd_dst):
        out = out.at[dst * Hh:(dst + 1) * Hh].set(bb[src * Hh:(src + 1) * Hh])
    return out[None, :]


def pack_params(params):
    """One-time packing of weights into the kernel's MXU-friendly layout.

    Call this ONCE at init / after each optimizer step, NOT inside the per-call
    loss function (keeps ~16 dynamic-update-slices + transposes off the hot path).
    """
    wtag_t = params['w_tag'].T                     # (2H, K): rows [fwd H | bwd H]
    return dict(
        emb=params['emb'].astype(jnp.float32),
        wih_blk=_pack_gate_cols(params['wih_f'].T, params['wih_b'].T),   # (2E, 8H)
        whh_blk=_pack_gate_cols(params['whh_f'].T, params['whh_b'].T),   # (2H, 8H)
        b_blk=_pack_gate_bias(params['bih_f'] + params['bhh_f'],
                              params['bih_b'] + params['bhh_b']),        # (1, 8H)
        wtag_f=wtag_t[:H, :], wtag_b=wtag_t[H:, :],                      # (H, K) each
        btag=params['b_tag'][None, :],
        start=params['start'][None, :], end=params['end'][None, :],
        trans=params['trans'],
    )


def init_params(key):
    keys = jax.random.split(key, 14)

    def u(k, shape, scale):
        return jax.random.uniform(k, shape, jnp.float32, -scale, scale)

    s = 1.0 / float(np.sqrt(H))       # nn.LSTM-style init scale
    s2 = 1.0 / float(np.sqrt(HID))    # nn.Linear-style init scale
    return dict(
        emb=jax.random.normal(keys[0], (VOC, EMB), jnp.float32),          # nn.Embedding ~ N(0,1)
        wih_f=u(keys[1], (4 * H, EMB), s), whh_f=u(keys[2], (4 * H, H), s),
        bih_f=u(keys[3], (4 * H,), s), bhh_f=u(keys[4], (4 * H,), s),
        wih_b=u(keys[5], (4 * H, EMB), s), whh_b=u(keys[6], (4 * H, H), s),
        bih_b=u(keys[7], (4 * H,), s), bhh_b=u(keys[8], (4 * H,), s),
        w_tag=u(keys[9], (K_TAGS, HID), s2), b_tag=u(keys[10], (K_TAGS,), s2),
        start=u(keys[11], (K_TAGS,), 0.1), end=u(keys[12], (K_TAGS,), 0.1),
        trans=u(keys[13], (K_TAGS, K_TAGS), 0.1),                          # CRF ~ U(-0.1, 0.1)
    )


# rough advisory cost of the kernel (for XLA scheduling of surrounding glue)
_FLOPS = (2 * TBP * (2 * EMB) * (8 * H)            # input projection matmul
          + T * 2 * BP * (2 * H) * (8 * H)         # T recurrent gate matmuls
          + 2 * (2 * TBP * H * K_TAGS)             # hidden2tag (fwd + bwd halves)
          + 2 * (T - 1) * BP * K_TAGS * K_TAGS     # gold-path transition matmul
          + 2 * (T - 1) * BP * K_TAGS * K_TAGS     # CRF forward-algorithm matmuls
          + 12 * TBP * 8 * H)                      # elementwise LSTM/CRF work (approx)
_TRANSCENDENTALS = (T * BP * 10 * H                # sigmoid (6H) + tanh (2H+2H) per step
                    + (T - 1) * BP * (K_TAGS + 2)  # CRF exp/log per step
                    + BP * (K_TAGS + 1))
_BYTES = 4 * (TBP * 2 * EMB + 3 * TBP              # emb_cat + tags/mask/mlast
              + 2 * EMB * 8 * H + 2 * H * 8 * H + 8 * H   # packed weights/bias
              + 2 * H * K_TAGS + 3 * K_TAGS + K_TAGS * K_TAGS + 1)


def bilstm_crf_loss(packed, X, tags, mask):
    """Equivalent of MyBiLSTM_CRF.forward(X, tags, mask) -> scalar loss.

    `packed` must come from pack_params() (one-time, outside the hot path).
    """
    # --- plain-JAX glue: embedding gather, layout transposes, batch padding ---
    emb = jnp.take(packed['emb'], X, axis=0)                          # (B, T, E)
    emb_t = jnp.transpose(emb, (1, 0, 2))                             # (T, B, E)
    # fused fwd/bwd input: row (t, b) = [emb[t,b], emb[T-1-t,b]]
    emb_cat = jnp.concatenate([emb_t, emb_t[::-1]], axis=-1)          # (T, B, 2E)
    # pad batch to one sublane tile (BP=8); padded rows carry zero embeddings
    emb_cat = jnp.pad(emb_cat, ((0, 0), (0, BP - B), (0, 0))).reshape(TBP, 2 * EMB)

    tags_t = jnp.transpose(tags.astype(jnp.int32), (1, 0))            # (T, B)
    tags_p = jnp.pad(tags_t, ((0, 0), (0, BP - B))).reshape(TBP, 1)

    mask_t = jnp.transpose(mask.astype(jnp.float32), (1, 0))          # (T, B)
    mask_p = jnp.pad(mask_t, ((0, 0), (0, BP - B)))                   # (T, BP), padded rows = 0
    mask_next = jnp.concatenate([mask_p[1:], jnp.zeros((1, BP), jnp.float32)], axis=0)
    mask_flat = mask_p.reshape(TBP, 1)
    mlast_flat = (mask_p - mask_next).reshape(TBP, 1)   # 1.0 at last valid step of each seq

    args = (
        emb_cat, tags_p, mask_flat, mlast_flat,
        packed['wih_blk'], packed['whh_blk'], packed['b_blk'],
        packed['wtag_f'], packed['wtag_b'], packed['btag'],
        packed['start'], packed['end'], packed['trans'],
    )

    vmem = pl.BlockSpec(memory_space=pltpu.MemorySpace.VMEM)
    out = pl.pallas_call(
        bilstm_crf_kernel,
        out_shape=jax.ShapeDtypeStruct((1, 1), jnp.float32),
        in_specs=[vmem] * len(args),
        out_specs=vmem,
        cost_estimate=pl.CostEstimate(
            flops=_FLOPS, transcendentals=_TRANSCENDENTALS, bytes_accessed=_BYTES),
    )(*args)
    return out[0, 0]


if __name__ == "__main__":
    key = jax.random.PRNGKey(0)
    pkey, xkey, tkey = jax.random.split(key, 3)
    params = init_params(pkey)
    packed = pack_params(params)    # weight packing hoisted out of the per-call path

    X = jax.random.randint(xkey, (B, T), 0, VOC, dtype=jnp.int32)
    tags = jax.random.randint(tkey, (B, T), 0, K_TAGS, dtype=jnp.int32)
    lengths = jnp.array([T, T - 3], dtype=jnp.int32)
    # contiguous mask; first timestep is always valid (torchcrf requirement)
    mask = jnp.arange(T, dtype=jnp.int32)[None, :] < lengths[:, None]     # (B, T) bool

    loss = jax.jit(bilstm_crf_loss)(packed, X, tags, mask)
    loss = jax.block_until_ready(loss)
    assert bool(jnp.isfinite(loss)), "loss is not finite"
    print("KERNEL_OK")
</pallas_src>

<mosaic_0001>
module attributes {stable_mosaic.version = 11 : i64} {
  func.func @bilstm_crf_kernel(%arg0: memref<64x32xf32, #tpu.memory_space<vmem>>, %arg1: memref<64x1xi32, #tpu.memory_space<vmem>>, %arg2: memref<64x1xf32, #tpu.memory_space<vmem>>, %arg3: memref<64x1xf32, #tpu.memory_space<vmem>>, %arg4: memref<32x128xf32, #tpu.memory_space<vmem>>, %arg5: memref<32x128xf32, #tpu.memory_space<vmem>>, %arg6: memref<1x128xf32, #tpu.memory_space<vmem>>, %arg7: memref<16x5xf32, #tpu.memory_space<vmem>>, %arg8: memref<16x5xf32, #tpu.memory_space<vmem>>, %arg9: memref<1x5xf32, #tpu.memory_space<vmem>>, %arg10: memref<1x5xf32, #tpu.memory_space<vmem>>, %arg11: memref<1x5xf32, #tpu.memory_space<vmem>>, %arg12: memref<5x5xf32, #tpu.memory_space<vmem>>, %arg13: memref<1x1xf32, #tpu.memory_space<vmem>>) attributes {dimension_semantics = [], scalar_prefetch = 0 : i64, scratch_operands = 0 : i64, tpu.core_type = #tpu.core_type<tc>} {
    %c0 = arith.constant 0 : index
    %c0_0 = arith.constant 0 : index
    %0 = vector.load %arg5[%c0, %c0_0] : memref<32x128xf32, #tpu.memory_space<vmem>>, vector<32x128xf32>
    %c0_1 = arith.constant 0 : index
    %c0_2 = arith.constant 0 : index
    %1 = vector.load %arg2[%c0_1, %c0_2] : memref<64x1xf32, #tpu.memory_space<vmem>>, vector<64x1xf32>
    %c0_3 = arith.constant 0 : index
    %c0_4 = arith.constant 0 : index
    %2 = vector.load %arg3[%c0_3, %c0_4] : memref<64x1xf32, #tpu.memory_space<vmem>>, vector<64x1xf32>
    %c0_5 = arith.constant 0 : index
    %c0_6 = arith.constant 0 : index
    %3 = vector.load %arg0[%c0_5, %c0_6] : memref<64x32xf32, #tpu.memory_space<vmem>>, vector<64x32xf32>
    %c0_7 = arith.constant 0 : index
    %c0_8 = arith.constant 0 : index
    %4 = vector.load %arg4[%c0_7, %c0_8] : memref<32x128xf32, #tpu.memory_space<vmem>>, vector<32x128xf32>
    %cst = arith.constant dense<0.000000e+00> : vector<64x128xf32>
    %5 = tpu.matmul %3, %4, %cst {dimension_numbers = #tpu.dot_dimension_numbers<[1], [0], [0], [1], [0, 0, 1, 1], [], []>} : vector<64x32xf32>, vector<32x128xf32>, vector<64x128xf32> -> vector<64x128xf32>
    %c0_9 = arith.constant 0 : index
    %c0_10 = arith.constant 0 : index
    %6 = vector.load %arg6[%c0_9, %c0_10] : memref<1x128xf32, #tpu.memory_space<vmem>>, vector<1x128xf32>
    %7 = vector.broadcast %6 : vector<1x128xf32> to vector<64x128xf32>
    %8 = arith.addf %5, %7 : vector<64x128xf32>
    %cst_11 = arith.constant 0.000000e+00 : f32
    %9 = vector.broadcast %cst_11 : f32 to vector<8x32xf32>
    %cst_12 = arith.constant 0.000000e+00 : f32
    %10 = vector.broadcast %cst_12 : f32 to vector<8x32xf32>
    %11 = vector.extract_strided_slice %8 {offsets = [0, 0], sizes = [8, 128], strides = [1, 1]} : vector<64x128xf32> to vector<8x128xf32>
    %cst_13 = arith.constant dense<0.000000e+00> : vector<8x128xf32>
    %12 = tpu.matmul %9, %0, %cst_13 {dimension_numbers = #tpu.dot_dimension_numbers<[1], [0], [0], [1], [0, 0, 1, 1], [], []>} : vector<8x32xf32>, vector<32x128xf32>, vector<8x128xf32> -> vector<8x128xf32>
    %13 = arith.addf %11, %12 : vector<8x128xf32>
    %14 = vector.extract_strided_slice %13 {offsets = [0, 0], sizes = [8, 96], strides = [1, 1]} : vector<8x128xf32> to vector<8x96xf32>
    %15 = arith.negf %14 : vector<8x96xf32>
    %16 = math.exp %15 : vector<8x96xf32>
    %cst_14 = arith.constant 1.000000e+00 : f32
    %17 = vector.broadcast %cst_14 : f32 to vector<8x96xf32>
    %18 = arith.addf %17, %16 : vector<8x96xf32>
    %19 = arith.divf %17, %18 : vector<8x96xf32>
    %20 = vector.extract_strided_slice %13 {offsets = [0, 96], sizes = [8, 32], strides = [1, 1]} : vector<8x128xf32> to vector<8x32xf32>
    %21 = math.tanh %20 : vector<8x32xf32>
    %22 = vector.extract_strided_slice %19 {offsets = [0, 0], sizes = [8, 32], strides = [1, 1]} : vector<8x96xf32> to vector<8x32xf32>
    %23 = vector.extract_strided_slice %19 {offsets = [0, 32], sizes = [8, 32], strides = [1, 1]} : vector<8x96xf32> to vector<8x32xf32>
    %24 = vector.extract_strided_slice %19 {offsets = [0, 64], sizes = [8, 32], strides = [1, 1]} : vector<8x96xf32> to vector<8x32xf32>
    %25 = arith.mulf %23, %10 : vector<8x32xf32>
    %26 = arith.mulf %22, %21 : vector<8x32xf32>
    %27 = arith.addf %25, %26 : vector<8x32xf32>
    %28 = math.tanh %27 : vector<8x32xf32>
    %29 = arith.mulf %24, %28 : vector<8x32xf32>
    %30 = vector.extract_strided_slice %29 {offsets = [0, 0], sizes = [8, 16], strides = [1, 1]} : vector<8x32xf32> to vector<8x16xf32>
    %31 = vector.extract_strided_slice %29 {offsets = [0, 16], sizes = [8, 16], strides = [1, 1]} : vector<8x32xf32> to vector<8x16xf32>
    %32 = vector.extract_strided_slice %8 {offsets = [8, 0], sizes = [8, 128], strides = [1, 1]} : vector<64x128xf32> to vector<8x128xf32>
    %cst_15 = arith.constant dense<0.000000e+00> : vector<8x128xf32>
    %33 = tpu.matmul %29, %0, %cst_15 {dimension_numbers = #tpu.dot_dimension_numbers<[1], [0], [0], [1], [0, 0, 1, 1], [], []>} : vector<8x32xf32>, vector<32x128xf32>, vector<8x128xf32> -> vector<8x128xf32>
    %34 = arith.addf %32, %33 : vector<8x128xf32>
    %35 = vector.extract_strided_slice %34 {offsets = [0, 0], sizes = [8, 96], strides = [1, 1]} : vector<8x128xf32> to vector<8x96xf32>
    %36 = arith.negf %35 : vector<8x96xf32>
    %37 = math.exp %36 : vector<8x96xf32>
    %cst_16 = arith.constant 1.000000e+00 : f32
    %38 = vector.broadcast %cst_16 : f32 to vector<8x96xf32>
    %39 = arith.addf %38, %37 : vector<8x96xf32>
    %40 = arith.divf %38, %39 : vector<8x96xf32>
    %41 = vector.extract_strided_slice %34 {offsets = [0, 96], sizes = [8, 32], strides = [1, 1]} : vector<8x128xf32> to vector<8x32xf32>
    %42 = math.tanh %41 : vector<8x32xf32>
    %43 = vector.extract_strided_slice %40 {offsets = [0, 0], sizes = [8, 32], strides = [1, 1]} : vector<8x96xf32> to vector<8x32xf32>
    %44 = vector.extract_strided_slice %40 {offsets = [0, 32], sizes = [8, 32], strides = [1, 1]} : vector<8x96xf32> to vector<8x32xf32>
    %45 = vector.extract_strided_slice %40 {offsets = [0, 64], sizes = [8, 32], strides = [1, 1]} : vector<8x96xf32> to vector<8x32xf32>
    %46 = arith.mulf %44, %27 : vector<8x32xf32>
    %47 = arith.mulf %43, %42 : vector<8x32xf32>
    %48 = arith.addf %46, %47 : vector<8x32xf32>
    %49 = math.tanh %48 : vector<8x32xf32>
    %50 = arith.mulf %45, %49 : vector<8x32xf32>
    %51 = vector.extract_strided_slice %50 {offsets = [0, 0], sizes = [8, 16], strides = [1, 1]} : vector<8x32xf32> to vector<8x16xf32>
    %52 = vector.extract_strided_slice %50 {offsets = [0, 16], sizes = [8, 16], strides = [1, 1]} : vector<8x32xf32> to vector<8x16xf32>
    %53 = vector.extract_strided_slice %8 {offsets = [16, 0], sizes = [8, 128], strides = [1, 1]} : vector<64x128xf32> to vector<8x128xf32>
    %cst_17 = arith.constant dense<0.000000e+00> : vector<8x128xf32>
    %54 = tpu.matmul %50, %0, %cst_17 {dimension_numbers = #tpu.dot_dimension_numbers<[1], [0], [0], [1], [0, 0, 1, 1], [], []>} : vector<8x32xf32>, vector<32x128xf32>, vector<8x128xf32> -> vector<8x128xf32>
    %55 = arith.addf %53, %54 : vector<8x128xf32>
    %56 = vector.extract_strided_slice %55 {offsets = [0, 0], sizes = [8, 96], strides = [1, 1]} : vector<8x128xf32> to vector<8x96xf32>
    %57 = arith.negf %56 : vector<8x96xf32>
    %58 = math.exp %57 : vector<8x96xf32>
    %cst_18 = arith.constant 1.000000e+00 : f32
    %59 = vector.broadcast %cst_18 : f32 to vector<8x96xf32>
    %60 = arith.addf %59, %58 : vector<8x96xf32>
    %61 = arith.divf %59, %60 : vector<8x96xf32>
    %62 = vector.extract_strided_slice %55 {offsets = [0, 96], sizes = [8, 32], strides = [1, 1]} : vector<8x128xf32> to vector<8x32xf32>
    %63 = math.tanh %62 : vector<8x32xf32>
    %64 = vector.extract_strided_slice %61 {offsets = [0, 0], sizes = [8, 32], strides = [1, 1]} : vector<8x96xf32> to vector<8x32xf32>
    %65 = vector.extract_strided_slice %61 {offsets = [0, 32], sizes = [8, 32], strides = [1, 1]} : vector<8x96xf32> to vector<8x32xf32>
    %66 = vector.extract_strided_slice %61 {offsets = [0, 64], sizes = [8, 32], strides = [1, 1]} : vector<8x96xf32> to vector<8x32xf32>
    %67 = arith.mulf %65, %48 : vector<8x32xf32>
    %68 = arith.mulf %64, %63 : vector<8x32xf32>
    %69 = arith.addf %67, %68 : vector<8x32xf32>
    %70 = math.tanh %69 : vector<8x32xf32>
    %71 = arith.mulf %66, %70 : vector<8x32xf32>
    %72 = vector.extract_strided_slice %71 {offsets = [0, 0], sizes = [8, 16], strides = [1, 1]} : vector<8x32xf32> to vector<8x16xf32>
    %73 = vector.extract_strided_slice %71 {offsets = [0, 16], sizes = [8, 16], strides = [1, 1]} : vector<8x32xf32> to vector<8x16xf32>
    %74 = vector.extract_strided_slice %8 {offsets = [24, 0], sizes = [8, 128], strides = [1, 1]} : vector<64x128xf32> to vector<8x128xf32>
    %cst_19 = arith.constant dense<0.000000e+00> : vector<8x128xf32>
    %75 = tpu.matmul %71, %0, %cst_19 {dimension_numbers = #tpu.dot_dimension_numbers<[1], [0], [0], [1], [0, 0, 1, 1], [], []>} : vector<8x32xf32>, vector<32x128xf32>, vector<8x128xf32> -> vector<8x128xf32>
    %76 = arith.addf %74, %75 : vector<8x128xf32>
    %77 = vector.extract_strided_slice %76 {offsets = [0, 0], sizes = [8, 96], strides = [1, 1]} : vector<8x128xf32> to vector<8x96xf32>
    %78 = arith.negf %77 : vector<8x96xf32>
    %79 = math.exp %78 : vector<8x96xf32>
    %cst_20 = arith.constant 1.000000e+00 : f32
    %80 = vector.broadcast %cst_20 : f32 to vector<8x96xf32>
    %81 = arith.addf %80, %79 : vector<8x96xf32>
    %82 = arith.divf %80, %81 : vector<8x96xf32>
    %83 = vector.extract_strided_slice %76 {offsets = [0, 96], sizes = [8, 32], strides = [1, 1]} : vector<8x128xf32> to vector<8x32xf32>
    %84 = math.tanh %83 : vector<8x32xf32>
    %85 = vector.extract_strided_slice %82 {offsets = [0, 0], sizes = [8, 32], strides = [1, 1]} : vector<8x96xf32> to vector<8x32xf32>
    %86 = vector.extract_strided_slice %82 {offsets = [0, 32], sizes = [8, 32], strides = [1, 1]} : vector<8x96xf32> to vector<8x32xf32>
    %87 = vector.extract_strided_slice %82 {offsets = [0, 64], sizes = [8, 32], strides = [1, 1]} : vector<8x96xf32> to vector<8x32xf32>
    %88 = arith.mulf %86, %69 : vector<8x32xf32>
    %89 = arith.mulf %85, %84 : vector<8x32xf32>
    %90 = arith.addf %88, %89 : vector<8x32xf32>
    %91 = math.tanh %90 : vector<8x32xf32>
    %92 = arith.mulf %87, %91 : vector<8x32xf32>
    %93 = vector.extract_strided_slice %92 {offsets = [0, 0], sizes = [8, 16], strides = [1, 1]} : vector<8x32xf32> to vector<8x16xf32>
    %94 = vector.extract_strided_slice %92 {offsets = [0, 16], sizes = [8, 16], strides = [1, 1]} : vector<8x32xf32> to vector<8x16xf32>
    %95 = vector.extract_strided_slice %8 {offsets = [32, 0], sizes = [8, 128], strides = [1, 1]} : vector<64x128xf32> to vector<8x128xf32>
    %cst_21 = arith.constant dense<0.000000e+00> : vector<8x128xf32>
    %96 = tpu.matmul %92, %0, %cst_21 {dimension_numbers = #tpu.dot_dimension_numbers<[1], [0], [0], [1], [0, 0, 1, 1], [], []>} : vector<8x32xf32>, vector<32x128xf32>, vector<8x128xf32> -> vector<8x128xf32>
    %97 = arith.addf %95, %96 : vector<8x128xf32>
    %98 = vector.extract_strided_slice %97 {offsets = [0, 0], sizes = [8, 96], strides = [1, 1]} : vector<8x128xf32> to vector<8x96xf32>
    %99 = arith.negf %98 : vector<8x96xf32>
    %100 = math.exp %99 : vector<8x96xf32>
    %cst_22 = arith.constant 1.000000e+00 : f32
    %101 = vector.broadcast %cst_22 : f32 to vector<8x96xf32>
    %102 = arith.addf %101, %100 : vector<8x96xf32>
    %103 = arith.divf %101, %102 : vector<8x96xf32>
    %104 = vector.extract_strided_slice %97 {offsets = [0, 96], sizes = [8, 32], strides = [1, 1]} : vector<8x128xf32> to vector<8x32xf32>
    %105 = math.tanh %104 : vector<8x32xf32>
    %106 = vector.extract_strided_slice %103 {offsets = [0, 0], sizes = [8, 32], strides = [1, 1]} : vector<8x96xf32> to vector<8x32xf32>
    %107 = vector.extract_strided_slice %103 {offsets = [0, 32], sizes = [8, 32], strides = [1, 1]} : vector<8x96xf32> to vector<8x32xf32>
    %108 = vector.extract_strided_slice %103 {offsets = [0, 64], sizes = [8, 32], strides = [1, 1]} : vector<8x96xf32> to vector<8x32xf32>
    %109 = arith.mulf %107, %90 : vector<8x32xf32>
    %110 = arith.mulf %106, %105 : vector<8x32xf32>
    %111 = arith.addf %109, %110 : vector<8x32xf32>
    %112 = math.tanh %111 : vector<8x32xf32>
    %113 = arith.mulf %108, %112 : vector<8x32xf32>
    %114 = vector.extract_strided_slice %113 {offsets = [0, 0], sizes = [8, 16], strides = [1, 1]} : vector<8x32xf32> to vector<8x16xf32>
    %115 = vector.extract_strided_slice %113 {offsets = [0, 16], sizes = [8, 16], strides = [1, 1]} : vector<8x32xf32> to vector<8x16xf32>
    %116 = vector.extract_strided_slice %8 {offsets = [40, 0], sizes = [8, 128], strides = [1, 1]} : vector<64x128xf32> to vector<8x128xf32>
    %cst_23 = arith.constant dense<0.000000e+00> : vector<8x128xf32>
    %117 = tpu.matmul %113, %0, %cst_23 {dimension_numbers = #tpu.dot_dimension_numbers<[1], [0], [0], [1], [0, 0, 1, 1], [], []>} : vector<8x32xf32>, vector<32x128xf32>, vector<8x128xf32> -> vector<8x128xf32>
    %118 = arith.addf %116, %117 : vector<8x128xf32>
    %119 = vector.extract_strided_slice %118 {offsets = [0, 0], sizes = [8, 96], strides = [1, 1]} : vector<8x128xf32> to vector<8x96xf32>
    %120 = arith.negf %119 : vector<8x96xf32>
    %121 = math.exp %120 : vector<8x96xf32>
    %cst_24 = arith.constant 1.000000e+00 : f32
    %122 = vector.broadcast %cst_24 : f32 to vector<8x96xf32>
    %123 = arith.addf %122, %121 : vector<8x96xf32>
    %124 = arith.divf %122, %123 : vector<8x96xf32>
    %125 = vector.extract_strided_slice %118 {offsets = [0, 96], sizes = [8, 32], strides = [1, 1]} : vector<8x128xf32> to vector<8x32xf32>
    %126 = math.tanh %125 : vector<8x32xf32>
    %127 = vector.extract_strided_slice %124 {offsets = [0, 0], sizes = [8, 32], strides = [1, 1]} : vector<8x96xf32> to vector<8x32xf32>
    %128 = vector.extract_strided_slice %124 {offsets = [0, 32], sizes = [8, 32], strides = [1, 1]} : vector<8x96xf32> to vector<8x32xf32>
    %129 = vector.extract_strided_slice %124 {offsets = [0, 64], sizes = [8, 32], strides = [1, 1]} : vector<8x96xf32> to vector<8x32xf32>
    %130 = arith.mulf %128, %111 : vector<8x32xf32>
    %131 = arith.mulf %127, %126 : vector<8x32xf32>
    %132 = arith.addf %130, %131 : vector<8x32xf32>
    %133 = math.tanh %132 : vector<8x32xf32>
    %134 = arith.mulf %129, %133 : vector<8x32xf32>
    %135 = vector.extract_strided_slice %134 {offsets = [0, 0], sizes = [8, 16], strides = [1, 1]} : vector<8x32xf32> to vector<8x16xf32>
    %136 = vector.extract_strided_slice %134 {offsets = [0, 16], sizes = [8, 16], strides = [1, 1]} : vector<8x32xf32> to vector<8x16xf32>
    %137 = vector.extract_strided_slice %8 {offsets = [48, 0], sizes = [8, 128], strides = [1, 1]} : vector<64x128xf32> to vector<8x128xf32>
    %cst_25 = arith.constant dense<0.000000e+00> : vector<8x128xf32>
    %138 = tpu.matmul %134, %0, %cst_25 {dimension_numbers = #tpu.dot_dimension_numbers<[1], [0], [0], [1], [0, 0, 1, 1], [], []>} : vector<8x32xf32>, vector<32x128xf32>, vector<8x128xf32> -> vector<8x128xf32>
    %139 = arith.addf %137, %138 : vector<8x128xf32>
    %140 = vector.extract_strided_slice %139 {offsets = [0, 0], sizes = [8, 96], strides = [1, 1]} : vector<8x128xf32> to vector<8x96xf32>
    %141 = arith.negf %140 : vector<8x96xf32>
    %142 = math.exp %141 : vector<8x96xf32>
    %cst_26 = arith.constant 1.000000e+00 : f32
    %143 = vector.broadcast %cst_26 : f32 to vector<8x96xf32>
    %144 = arith.addf %143, %142 : vector<8x96xf32>
    %145 = arith.divf %143, %144 : vector<8x96xf32>
    %146 = vector.extract_strided_slice %139 {offsets = [0, 96], sizes = [8, 32], strides = [1, 1]} : vector<8x128xf32> to vector<8x32xf32>
    %147 = math.tanh %146 : vector<8x32xf32>
    %148 = vector.extract_strided_slice %145 {offsets = [0, 0], sizes = [8, 32], strides = [1, 1]} : vector<8x96xf32> to vector<8x32xf32>
    %149 = vector.extract_strided_slice %145 {offsets = [0, 32], sizes = [8, 32], strides = [1, 1]} : vector<8x96xf32> to vector<8x32xf32>
    %150 = vector.extract_strided_slice %145 {offsets = [0, 64], sizes = [8, 32], strides = [1, 1]} : vector<8x96xf32> to vector<8x32xf32>
    %151 = arith.mulf %149, %132 : vector<8x32xf32>
    %152 = arith.mulf %148, %147 : vector<8x32xf32>
    %153 = arith.addf %151, %152 : vector<8x32xf32>
    %154 = math.tanh %153 : vector<8x32xf32>
    %155 = arith.mulf %150, %154 : vector<8x32xf32>
    %156 = vector.extract_strided_slice %155 {offsets = [0, 0], sizes = [8, 16], strides = [1, 1]} : vector<8x32xf32> to vector<8x16xf32>
    %157 = vector.extract_strided_slice %155 {offsets = [0, 16], sizes = [8, 16], strides = [1, 1]} : vector<8x32xf32> to vector<8x16xf32>
    %158 = vector.extract_strided_slice %8 {offsets = [56, 0], sizes = [8, 128], strides = [1, 1]} : vector<64x128xf32> to vector<8x128xf32>
    %cst_27 = arith.constant dense<0.000000e+00> : vector<8x128xf32>
    %159 = tpu.matmul %155, %0, %cst_27 {dimension_numbers = #tpu.dot_dimension_numbers<[1], [0], [0], [1], [0, 0, 1, 1], [], []>} : vector<8x32xf32>, vector<32x128xf32>, vector<8x128xf32> -> vector<8x128xf32>
    %160 = arith.addf %158, %159 : vector<8x128xf32>
    %161 = vector.extract_strided_slice %160 {offsets = [0, 0], sizes = [8, 96], strides = [1, 1]} : vector<8x128xf32> to vector<8x96xf32>
    %162 = arith.negf %161 : vector<8x96xf32>
    %163 = math.exp %162 : vector<8x96xf32>
    %cst_28 = arith.constant 1.000000e+00 : f32
    %164 = vector.broadcast %cst_28 : f32 to vector<8x96xf32>
    %165 = arith.addf %164, %163 : vector<8x96xf32>
    %166 = arith.divf %164, %165 : vector<8x96xf32>
    %167 = vector.extract_strided_slice %160 {offsets = [0, 96], sizes = [8, 32], strides = [1, 1]} : vector<8x128xf32> to vector<8x32xf32>
    %168 = math.tanh %167 : vector<8x32xf32>
    %169 = vector.extract_strided_slice %166 {offsets = [0, 0], sizes = [8, 32], strides = [1, 1]} : vector<8x96xf32> to vector<8x32xf32>
    %170 = vector.extract_strided_slice %166 {offsets = [0, 32], sizes = [8, 32], strides = [1, 1]} : vector<8x96xf32> to vector<8x32xf32>
    %171 = vector.extract_strided_slice %166 {offsets = [0, 64], sizes = [8, 32], strides = [1, 1]} : vector<8x96xf32> to vector<8x32xf32>
    %172 = arith.mulf %170, %153 : vector<8x32xf32>
    %173 = arith.mulf %169, %168 : vector<8x32xf32>
    %174 = arith.addf %172, %173 : vector<8x32xf32>
    %175 = math.tanh %174 : vector<8x32xf32>
    %176 = arith.mulf %171, %175 : vector<8x32xf32>
    %177 = vector.extract_strided_slice %176 {offsets = [0, 0], sizes = [8, 16], strides = [1, 1]} : vector<8x32xf32> to vector<8x16xf32>
    %178 = vector.extract_strided_slice %176 {offsets = [0, 16], sizes = [8, 16], strides = [1, 1]} : vector<8x32xf32> to vector<8x16xf32>
    %179 = tpu.concatenate %30, %51, %72, %93, %114, %135, %156, %177 in 0 : vector<8x16xf32>, vector<8x16xf32>, vector<8x16xf32>, vector<8x16xf32>, vector<8x16xf32>, vector<8x16xf32>, vector<8x16xf32>, vector<8x16xf32> -> vector<64x16xf32>
    %180 = tpu.concatenate %178, %157, %136, %115, %94, %73, %52, %31 in 0 : vector<8x16xf32>, vector<8x16xf32>, vector<8x16xf32>, vector<8x16xf32>, vector<8x16xf32>, vector<8x16xf32>, vector<8x16xf32>, vector<8x16xf32> -> vector<64x16xf32>
    %c0_29 = arith.constant 0 : index
    %c0_30 = arith.constant 0 : index
    %181 = vector.load %arg7[%c0_29, %c0_30] : memref<16x5xf32, #tpu.memory_space<vmem>>, vector<16x5xf32>
    %cst_31 = arith.constant dense<0.000000e+00> : vector<64x5xf32>
    %182 = tpu.matmul %179, %181, %cst_31 {dimension_numbers = #tpu.dot_dimension_numbers<[1], [0], [0], [1], [0, 0, 1, 1], [], []>} : vector<64x16xf32>, vector<16x5xf32>, vector<64x5xf32> -> vector<64x5xf32>
    %c0_32 = arith.constant 0 : index
    %c0_33 = arith.constant 0 : index
    %183 = vector.load %arg8[%c0_32, %c0_33] : memref<16x5xf32, #tpu.memory_space<vmem>>, vector<16x5xf32>
    %cst_34 = arith.constant dense<0.000000e+00> : vector<64x5xf32>
    %184 = tpu.matmul %180, %183, %cst_34 {dimension_numbers = #tpu.dot_dimension_numbers<[1], [0], [0], [1], [0, 0, 1, 1], [], []>} : vector<64x16xf32>, vector<16x5xf32>, vector<64x5xf32> -> vector<64x5xf32>
    %185 = arith.addf %182, %184 : vector<64x5xf32>
    %c0_35 = arith.constant 0 : index
    %c0_36 = arith.constant 0 : index
    %186 = vector.load %arg9[%c0_35, %c0_36] : memref<1x5xf32, #tpu.memory_space<vmem>>, vector<1x5xf32>
    %187 = vector.broadcast %186 : vector<1x5xf32> to vector<64x5xf32>
    %188 = arith.addf %185, %187 : vector<64x5xf32>
    %c0_37 = arith.constant 0 : index
    %c0_38 = arith.constant 0 : index
    %189 = vector.load %arg10[%c0_37, %c0_38] : memref<1x5xf32, #tpu.memory_space<vmem>>, vector<1x5xf32>
    %c0_39 = arith.constant 0 : index
    %c0_40 = arith.constant 0 : index
    %190 = vector.load %arg11[%c0_39, %c0_40] : memref<1x5xf32, #tpu.memory_space<vmem>>, vector<1x5xf32>
    %c0_41 = arith.constant 0 : index
    %c0_42 = arith.constant 0 : index
    %191 = vector.load %arg12[%c0_41, %c0_42] : memref<5x5xf32, #tpu.memory_space<vmem>>, vector<5x5xf32>
    %192 = tpu.iota {dimensions = array<i32: 1>} : vector<64x5xi32>
    %c0_43 = arith.constant 0 : index
    %c0_44 = arith.constant 0 : index
    %193 = vector.load %arg1[%c0_43, %c0_44] : memref<64x1xi32, #tpu.memory_space<vmem>>, vector<64x1xi32>
    %194 = vector.broadcast %193 : vector<64x1xi32> to vector<64x5xi32>
    %195 = arith.cmpi eq, %192, %194 : vector<64x5xi32>
    %196 = arith.extui %195 : vector<64x5xi1> to vector<64x5xi32>
    %197 = arith.sitofp %196 : vector<64x5xi32> to vector<64x5xf32>
    %198 = arith.mulf %197, %188 : vector<64x5xf32>
    %199 = vector.broadcast %1 : vector<64x1xf32> to vector<64x5xf32>
    %200 = arith.mulf %198, %199 : vector<64x5xf32>
    %cst_45 = arith.constant dense<0.000000e+00> : vector<64xf32>
    %201 = vector.multi_reduction <add>, %200, %cst_45 [1] : vector<64x5xf32> to vector<64xf32>
    %202 = vector.shape_cast %201 : vector<64xf32> to vector<64x1xf32>
    %203 = vector.extract_strided_slice %197 {offsets = [0, 0], sizes = [8, 5], strides = [1, 1]} : vector<64x5xf32> to vector<8x5xf32>
    %204 = vector.broadcast %189 : vector<1x5xf32> to vector<8x5xf32>
    %205 = arith.mulf %203, %204 : vector<8x5xf32>
    %206 = vector.extract_strided_slice %1 {offsets = [0, 0], sizes = [8, 1], strides = [1, 1]} : vector<64x1xf32> to vector<8x1xf32>
    %207 = vector.broadcast %206 : vector<8x1xf32> to vector<8x5xf32>
    %208 = arith.mulf %205, %207 : vector<8x5xf32>
    %cst_46 = arith.constant dense<0.000000e+00> : vector<8xf32>
    %209 = vector.multi_reduction <add>, %208, %cst_46 [1] : vector<8x5xf32> to vector<8xf32>
    %210 = vector.shape_cast %209 : vector<8xf32> to vector<8x1xf32>
    %211 = vector.broadcast %190 : vector<1x5xf32> to vector<64x5xf32>
    %212 = arith.mulf %197, %211 : vector<64x5xf32>
    %213 = vector.broadcast %2 : vector<64x1xf32> to vector<64x5xf32>
    %214 = arith.mulf %212, %213 : vector<64x5xf32>
    %cst_47 = arith.constant dense<0.000000e+00> : vector<64xf32>
    %215 = vector.multi_reduction <add>, %214, %cst_47 [1] : vector<64x5xf32> to vector<64xf32>
    %216 = vector.shape_cast %215 : vector<64xf32> to vector<64x1xf32>
    %217 = vector.extract_strided_slice %197 {offsets = [0, 0], sizes = [56, 5], strides = [1, 1]} : vector<64x5xf32> to vector<56x5xf32>
    %cst_48 = arith.constant dense<0.000000e+00> : vector<56x5xf32>
    %218 = tpu.matmul %217, %191, %cst_48 {dimension_numbers = #tpu.dot_dimension_numbers<[1], [0], [0], [1], [0, 0, 1, 1], [], []>} : vector<56x5xf32>, vector<5x5xf32>, vector<56x5xf32> -> vector<56x5xf32>
    %219 = vector.extract_strided_slice %197 {offsets = [8, 0], sizes = [56, 5], strides = [1, 1]} : vector<64x5xf32> to vector<56x5xf32>
    %220 = arith.mulf %218, %219 : vector<56x5xf32>
    %cst_49 = arith.constant dense<0.000000e+00> : vector<56xf32>
    %221 = vector.multi_reduction <add>, %220, %cst_49 [1] : vector<56x5xf32> to vector<56xf32>
    %222 = vector.shape_cast %221 : vector<56xf32> to vector<56x1xf32>
    %223 = vector.extract_strided_slice %1 {offsets = [8, 0], sizes = [56, 1], strides = [1, 1]} : vector<64x1xf32> to vector<56x1xf32>
    %224 = arith.mulf %222, %223 : vector<56x1xf32>
    %cst_50 = arith.constant dense<0.000000e+00> : vector<1xf32>
    %225 = vector.multi_reduction <add>, %202, %cst_50 [0] : vector<64x1xf32> to vector<1xf32>
    %226 = vector.shape_cast %225 : vector<1xf32> to vector<1x1xf32>
    %cst_51 = arith.constant dense<0.000000e+00> : vector<1xf32>
    %227 = vector.multi_reduction <add>, %210, %cst_51 [0] : vector<8x1xf32> to vector<1xf32>
    %228 = vector.shape_cast %227 : vector<1xf32> to vector<1x1xf32>
    %229 = arith.addf %226, %228 : vector<1x1xf32>
    %cst_52 = arith.constant dense<0.000000e+00> : vector<1xf32>
    %230 = vector.multi_reduction <add>, %216, %cst_52 [0] : vector<64x1xf32> to vector<1xf32>
    %231 = vector.shape_cast %230 : vector<1xf32> to vector<1x1xf32>
    %232 = arith.addf %229, %231 : vector<1x1xf32>
    %cst_53 = arith.constant dense<0.000000e+00> : vector<1xf32>
    %233 = vector.multi_reduction <add>, %224, %cst_53 [0] : vector<56x1xf32> to vector<1xf32>
    %234 = vector.shape_cast %233 : vector<1xf32> to vector<1x1xf32>
    %235 = arith.addf %232, %234 : vector<1x1xf32>
    %cst_54 = arith.constant dense<0xFF800000> : vector<5xf32>
    %236 = vector.multi_reduction <maximumf>, %191, %cst_54 [0] : vector<5x5xf32> to vector<5xf32>
    %237 = vector.shape_cast %236 : vector<5xf32> to vector<1x5xf32>
    %238 = vector.broadcast %237 : vector<1x5xf32> to vector<5x5xf32>
    %239 = arith.subf %191, %238 : vector<5x5xf32>
    %240 = math.exp %239 : vector<5x5xf32>
    %241 = vector.extract_strided_slice %1 {offsets = [0, 0], sizes = [8, 1], strides = [1, 1]} : vector<64x1xf32> to vector<8x1xf32>
    %242 = vector.extract_strided_slice %188 {offsets = [0, 0], sizes = [8, 5], strides = [1, 1]} : vector<64x5xf32> to vector<8x5xf32>
    %243 = vector.broadcast %189 : vector<1x5xf32> to vector<8x5xf32>
    %244 = arith.addf %243, %242 : vector<8x5xf32>
    %245 = vector.extract_strided_slice %188 {offsets = [8, 0], sizes = [8, 5], strides = [1, 1]} : vector<64x5xf32> to vector<8x5xf32>
    %246 = vector.extract_strided_slice %1 {offsets = [8, 0], sizes = [8, 1], strides = [1, 1]} : vector<64x1xf32> to vector<8x1xf32>
    %cst_55 = arith.constant dense<0xFF800000> : vector<8xf32>
    %247 = vector.multi_reduction <maximumf>, %244, %cst_55 [1] : vector<8x5xf32> to vector<8xf32>
    %248 = vector.shape_cast %247 : vector<8xf32> to vector<8x1xf32>
    %249 = vector.broadcast %248 : vector<8x1xf32> to vector<8x5xf32>
    %250 = arith.subf %244, %249 : vector<8x5xf32>
    %251 = math.exp %250 : vector<8x5xf32>
    %252 = vector.broadcast %248 : vector<8x1xf32> to vector<8x5xf32>
    %253 = arith.addf %245, %252 : vector<8x5xf32>
    %254 = vector.broadcast %237 : vector<1x5xf32> to vector<8x5xf32>
    %255 = arith.addf %253, %254 : vector<8x5xf32>
    %cst_56 = arith.constant dense<0.000000e+00> : vector<8x5xf32>
    %256 = tpu.matmul %251, %240, %cst_56 {dimension_numbers = #tpu.dot_dimension_numbers<[1], [0], [0], [1], [0, 0, 1, 1], [], []>} : vector<8x5xf32>, vector<5x5xf32>, vector<8x5xf32> -> vector<8x5xf32>
    %257 = math.log %256 : vector<8x5xf32>
    %258 = arith.addf %255, %257 : vector<8x5xf32>
    %cst_57 = arith.constant 0.000000e+00 : f32
    %259 = vector.broadcast %cst_57 : f32 to vector<8x1xf32>
    %260 = arith.cmpf ogt, %246, %259 : vector<8x1xf32>
    %261 = vector.shape_cast %260 : vector<8x1xi1> to vector<8x1xi1>
    %262 = vector.broadcast %261 : vector<8x1xi1> to vector<8x5xi1>
    %263 = arith.select %262, %258, %244 : vector<8x5xi1>, vector<8x5xf32>
    %264 = vector.extract_strided_slice %188 {offsets = [16, 0], sizes = [8, 5], strides = [1, 1]} : vector<64x5xf32> to vector<8x5xf32>
    %265 = vector.extract_strided_slice %1 {offsets = [16, 0], sizes = [8, 1], strides = [1, 1]} : vector<64x1xf32> to vector<8x1xf32>
    %cst_58 = arith.constant dense<0xFF800000> : vector<8xf32>
    %266 = vector.multi_reduction <maximumf>, %263, %cst_58 [1] : vector<8x5xf32> to vector<8xf32>
    %267 = vector.shape_cast %266 : vector<8xf32> to vector<8x1xf32>
    %268 = vector.broadcast %267 : vector<8x1xf32> to vector<8x5xf32>
    %269 = arith.subf %263, %268 : vector<8x5xf32>
    %270 = math.exp %269 : vector<8x5xf32>
    %271 = vector.broadcast %267 : vector<8x1xf32> to vector<8x5xf32>
    %272 = arith.addf %264, %271 : vector<8x5xf32>
    %273 = vector.broadcast %237 : vector<1x5xf32> to vector<8x5xf32>
    %274 = arith.addf %272, %273 : vector<8x5xf32>
    %cst_59 = arith.constant dense<0.000000e+00> : vector<8x5xf32>
    %275 = tpu.matmul %270, %240, %cst_59 {dimension_numbers = #tpu.dot_dimension_numbers<[1], [0], [0], [1], [0, 0, 1, 1], [], []>} : vector<8x5xf32>, vector<5x5xf32>, vector<8x5xf32> -> vector<8x5xf32>
    %276 = math.log %275 : vector<8x5xf32>
    %277 = arith.addf %274, %276 : vector<8x5xf32>
    %cst_60 = arith.constant 0.000000e+00 : f32
    %278 = vector.broadcast %cst_60 : f32 to vector<8x1xf32>
    %279 = arith.cmpf ogt, %265, %278 : vector<8x1xf32>
    %280 = vector.shape_cast %279 : vector<8x1xi1> to vector<8x1xi1>
    %281 = vector.broadcast %280 : vector<8x1xi1> to vector<8x5xi1>
    %282 = arith.select %281, %277, %263 : vector<8x5xi1>, vector<8x5xf32>
    %283 = vector.extract_strided_slice %188 {offsets = [24, 0], sizes = [8, 5], strides = [1, 1]} : vector<64x5xf32> to vector<8x5xf32>
    %284 = vector.extract_strided_slice %1 {offsets = [24, 0], sizes = [8, 1], strides = [1, 1]} : vector<64x1xf32> to vector<8x1xf32>
    %cst_61 = arith.constant dense<0xFF800000> : vector<8xf32>
    %285 = vector.multi_reduction <maximumf>, %282, %cst_61 [1] : vector<8x5xf32> to vector<8xf32>
    %286 = vector.shape_cast %285 : vector<8xf32> to vector<8x1xf32>
    %287 = vector.broadcast %286 : vector<8x1xf32> to vector<8x5xf32>
    %288 = arith.subf %282, %287 : vector<8x5xf32>
    %289 = math.exp %288 : vector<8x5xf32>
    %290 = vector.broadcast %286 : vector<8x1xf32> to vector<8x5xf32>
    %291 = arith.addf %283, %290 : vector<8x5xf32>
    %292 = vector.broadcast %237 : vector<1x5xf32> to vector<8x5xf32>
    %293 = arith.addf %291, %292 : vector<8x5xf32>
    %cst_62 = arith.constant dense<0.000000e+00> : vector<8x5xf32>
    %294 = tpu.matmul %289, %240, %cst_62 {dimension_numbers = #tpu.dot_dimension_numbers<[1], [0], [0], [1], [0, 0, 1, 1], [], []>} : vector<8x5xf32>, vector<5x5xf32>, vector<8x5xf32> -> vector<8x5xf32>
    %295 = math.log %294 : vector<8x5xf32>
    %296 = arith.addf %293, %295 : vector<8x5xf32>
    %cst_63 = arith.constant 0.000000e+00 : f32
    %297 = vector.broadcast %cst_63 : f32 to vector<8x1xf32>
    %298 = arith.cmpf ogt, %284, %297 : vector<8x1xf32>
    %299 = vector.shape_cast %298 : vector<8x1xi1> to vector<8x1xi1>
    %300 = vector.broadcast %299 : vector<8x1xi1> to vector<8x5xi1>
    %301 = arith.select %300, %296, %282 : vector<8x5xi1>, vector<8x5xf32>
    %302 = vector.extract_strided_slice %188 {offsets = [32, 0], sizes = [8, 5], strides = [1, 1]} : vector<64x5xf32> to vector<8x5xf32>
    %303 = vector.extract_strided_slice %1 {offsets = [32, 0], sizes = [8, 1], strides = [1, 1]} : vector<64x1xf32> to vector<8x1xf32>
    %cst_64 = arith.constant dense<0xFF800000> : vector<8xf32>
    %304 = vector.multi_reduction <maximumf>, %301, %cst_64 [1] : vector<8x5xf32> to vector<8xf32>
    %305 = vector.shape_cast %304 : vector<8xf32> to vector<8x1xf32>
    %306 = vector.broadcast %305 : vector<8x1xf32> to vector<8x5xf32>
    %307 = arith.subf %301, %306 : vector<8x5xf32>
    %308 = math.exp %307 : vector<8x5xf32>
    %309 = vector.broadcast %305 : vector<8x1xf32> to vector<8x5xf32>
    %310 = arith.addf %302, %309 : vector<8x5xf32>
    %311 = vector.broadcast %237 : vector<1x5xf32> to vector<8x5xf32>
    %312 = arith.addf %310, %311 : vector<8x5xf32>
    %cst_65 = arith.constant dense<0.000000e+00> : vector<8x5xf32>
    %313 = tpu.matmul %308, %240, %cst_65 {dimension_numbers = #tpu.dot_dimension_numbers<[1], [0], [0], [1], [0, 0, 1, 1], [], []>} : vector<8x5xf32>, vector<5x5xf32>, vector<8x5xf32> -> vector<8x5xf32>
    %314 = math.log %313 : vector<8x5xf32>
    %315 = arith.addf %312, %314 : vector<8x5xf32>
    %cst_66 = arith.constant 0.000000e+00 : f32
    %316 = vector.broadcast %cst_66 : f32 to vector<8x1xf32>
    %317 = arith.cmpf ogt, %303, %316 : vector<8x1xf32>
    %318 = vector.shape_cast %317 : vector<8x1xi1> to vector<8x1xi1>
    %319 = vector.broadcast %318 : vector<8x1xi1> to vector<8x5xi1>
    %320 = arith.select %319, %315, %301 : vector<8x5xi1>, vector<8x5xf32>
    %321 = vector.extract_strided_slice %188 {offsets = [40, 0], sizes = [8, 5], strides = [1, 1]} : vector<64x5xf32> to vector<8x5xf32>
    %322 = vector.extract_strided_slice %1 {offsets = [40, 0], sizes = [8, 1], strides = [1, 1]} : vector<64x1xf32> to vector<8x1xf32>
    %cst_67 = arith.constant dense<0xFF800000> : vector<8xf32>
    %323 = vector.multi_reduction <maximumf>, %320, %cst_67 [1] : vector<8x5xf32> to vector<8xf32>
    %324 = vector.shape_cast %323 : vector<8xf32> to vector<8x1xf32>
    %325 = vector.broadcast %324 : vector<8x1xf32> to vector<8x5xf32>
    %326 = arith.subf %320, %325 : vector<8x5xf32>
    %327 = math.exp %326 : vector<8x5xf32>
    %328 = vector.broadcast %324 : vector<8x1xf32> to vector<8x5xf32>
    %329 = arith.addf %321, %328 : vector<8x5xf32>
    %330 = vector.broadcast %237 : vector<1x5xf32> to vector<8x5xf32>
    %331 = arith.addf %329, %330 : vector<8x5xf32>
    %cst_68 = arith.constant dense<0.000000e+00> : vector<8x5xf32>
    %332 = tpu.matmul %327, %240, %cst_68 {dimension_numbers = #tpu.dot_dimension_numbers<[1], [0], [0], [1], [0, 0, 1, 1], [], []>} : vector<8x5xf32>, vector<5x5xf32>, vector<8x5xf32> -> vector<8x5xf32>
    %333 = math.log %332 : vector<8x5xf32>
    %334 = arith.addf %331, %333 : vector<8x5xf32>
    %cst_69 = arith.constant 0.000000e+00 : f32
    %335 = vector.broadcast %cst_69 : f32 to vector<8x1xf32>
    %336 = arith.cmpf ogt, %322, %335 : vector<8x1xf32>
    %337 = vector.shape_cast %336 : vector<8x1xi1> to vector<8x1xi1>
    %338 = vector.broadcast %337 : vector<8x1xi1> to vector<8x5xi1>
    %339 = arith.select %338, %334, %320 : vector<8x5xi1>, vector<8x5xf32>
    %340 = vector.extract_strided_slice %188 {offsets = [48, 0], sizes = [8, 5], strides = [1, 1]} : vector<64x5xf32> to vector<8x5xf32>
    %341 = vector.extract_strided_slice %1 {offsets = [48, 0], sizes = [8, 1], strides = [1, 1]} : vector<64x1xf32> to vector<8x1xf32>
    %cst_70 = arith.constant dense<0xFF800000> : vector<8xf32>
    %342 = vector.multi_reduction <maximumf>, %339, %cst_70 [1] : vector<8x5xf32> to vector<8xf32>
    %343 = vector.shape_cast %342 : vector<8xf32> to vector<8x1xf32>
    %344 = vector.broadcast %343 : vector<8x1xf32> to vector<8x5xf32>
    %345 = arith.subf %339, %344 : vector<8x5xf32>
    %346 = math.exp %345 : vector<8x5xf32>
    %347 = vector.broadcast %343 : vector<8x1xf32> to vector<8x5xf32>
    %348 = arith.addf %340, %347 : vector<8x5xf32>
    %349 = vector.broadcast %237 : vector<1x5xf32> to vector<8x5xf32>
    %350 = arith.addf %348, %349 : vector<8x5xf32>
    %cst_71 = arith.constant dense<0.000000e+00> : vector<8x5xf32>
    %351 = tpu.matmul %346, %240, %cst_71 {dimension_numbers = #tpu.dot_dimension_numbers<[1], [0], [0], [1], [0, 0, 1, 1], [], []>} : vector<8x5xf32>, vector<5x5xf32>, vector<8x5xf32> -> vector<8x5xf32>
    %352 = math.log %351 : vector<8x5xf32>
    %353 = arith.addf %350, %352 : vector<8x5xf32>
    %cst_72 = arith.constant 0.000000e+00 : f32
    %354 = vector.broadcast %cst_72 : f32 to vector<8x1xf32>
    %355 = arith.cmpf ogt, %341, %354 : vector<8x1xf32>
    %356 = vector.shape_cast %355 : vector<8x1xi1> to vector<8x1xi1>
    %357 = vector.broadcast %356 : vector<8x1xi1> to vector<8x5xi1>
    %358 = arith.select %357, %353, %339 : vector<8x5xi1>, vector<8x5xf32>
    %359 = vector.extract_strided_slice %188 {offsets = [56, 0], sizes = [8, 5], strides = [1, 1]} : vector<64x5xf32> to vector<8x5xf32>
    %360 = vector.extract_strided_slice %1 {offsets = [56, 0], sizes = [8, 1], strides = [1, 1]} : vector<64x1xf32> to vector<8x1xf32>
    %cst_73 = arith.constant dense<0xFF800000> : vector<8xf32>
    %361 = vector.multi_reduction <maximumf>, %358, %cst_73 [1] : vector<8x5xf32> to vector<8xf32>
    %362 = vector.shape_cast %361 : vector<8xf32> to vector<8x1xf32>
    %363 = vector.broadcast %362 : vector<8x1xf32> to vector<8x5xf32>
    %364 = arith.subf %358, %363 : vector<8x5xf32>
    %365 = math.exp %364 : vector<8x5xf32>
    %366 = vector.broadcast %362 : vector<8x1xf32> to vector<8x5xf32>
    %367 = arith.addf %359, %366 : vector<8x5xf32>
    %368 = vector.broadcast %237 : vector<1x5xf32> to vector<8x5xf32>
    %369 = arith.addf %367, %368 : vector<8x5xf32>
    %cst_74 = arith.constant dense<0.000000e+00> : vector<8x5xf32>
    %370 = tpu.matmul %365, %240, %cst_74 {dimension_numbers = #tpu.dot_dimension_numbers<[1], [0], [0], [1], [0, 0, 1, 1], [], []>} : vector<8x5xf32>, vector<5x5xf32>, vector<8x5xf32> -> vector<8x5xf32>
    %371 = math.log %370 : vector<8x5xf32>
    %372 = arith.addf %369, %371 : vector<8x5xf32>
    %cst_75 = arith.constant 0.000000e+00 : f32
    %373 = vector.broadcast %cst_75 : f32 to vector<8x1xf32>
    %374 = arith.cmpf ogt, %360, %373 : vector<8x1xf32>
    %375 = vector.shape_cast %374 : vector<8x1xi1> to vector<8x1xi1>
    %376 = vector.broadcast %375 : vector<8x1xi1> to vector<8x5xi1>
    %377 = arith.select %376, %372, %358 : vector<8x5xi1>, vector<8x5xf32>
    %378 = vector.broadcast %190 : vector<1x5xf32> to vector<8x5xf32>
    %379 = arith.addf %377, %378 : vector<8x5xf32>
    %cst_76 = arith.constant dense<0xFF800000> : vector<8xf32>
    %380 = vector.multi_reduction <maximumf>, %379, %cst_76 [1] : vector<8x5xf32> to vector<8xf32>
    %381 = vector.shape_cast %380 : vector<8xf32> to vector<8x1xf32>
    %382 = vector.broadcast %381 : vector<8x1xf32> to vector<8x5xf32>
    %383 = arith.subf %379, %382 : vector<8x5xf32>
    %384 = math.exp %383 : vector<8x5xf32>
    %cst_77 = arith.constant dense<0.000000e+00> : vector<8xf32>
    %385 = vector.multi_reduction <add>, %384, %cst_77 [1] : vector<8x5xf32> to vector<8xf32>
    %386 = vector.shape_cast %385 : vector<8xf32> to vector<8x1xf32>
    %387 = math.log %386 : vector<8x1xf32>
    %388 = arith.addf %381, %387 : vector<8x1xf32>
    %389 = arith.mulf %388, %241 : vector<8x1xf32>
    %cst_78 = arith.constant dense<0.000000e+00> : vector<1xf32>
    %390 = vector.multi_reduction <add>, %389, %cst_78 [0] : vector<8x1xf32> to vector<1xf32>
    %391 = vector.shape_cast %390 : vector<1xf32> to vector<1x1xf32>
    %392 = arith.subf %391, %235 : vector<1x1xf32>
    %c0_79 = arith.constant 0 : index
    %c0_80 = arith.constant 0 : index
    %393 = vector.load %arg13[%c0_79, %c0_80] : memref<1x1xf32, #tpu.memory_space<vmem>>, vector<1x1xf32>
    tpu.vector_store %arg13[%c0_79, %c0_80], %392 {strides = array<i32>} : memref<1x1xf32, #tpu.memory_space<vmem>>, vector<1x1xf32>,
    return
  }
}

</mosaic_0001>

<bundles_post_ra>
// kernel: bilstm_crf_loss.1
= control target key start
LH: loop header
LB: loop body
LE: loop exit
PB: predicated region body
PF: predicated region fallthrough
CT: control target
= control target key end

     0   :  { %v2931_v3 = vmov 0.0   ;;  %vm84_vm0 = vcmask 261120   ;;  %s3758_s0 = inlined_call_operand.vmem [shape: f32[64,32], index: 0, kind: input, shape index: {}]   ;;  %s3759_s1 = inlined_call_operand.vmem [shape: s32[64,1], index: 1, kind: input, shape index: {}]   ;;  %s3760_s2 = inlined_call_operand.vmem [shape: f32[64,1], index: 2, kind: input, shape index: {}]   ;;  %s3761_s3 = inlined_call_operand.vmem [shape: f32[64,1], index: 3, kind: input, shape index: {}]   ;;  %s3762_s4 = inlined_call_operand.vmem [shape: f32[32,128], index: 4, kind: input, shape index: {}]   ;;  %s3763_s5 = inlined_call_operand.vmem [shape: f32[32,128], index: 5, kind: input, shape index: {}]   ;;  %s3764_s6 = inlined_call_operand.vmem [shape: f32[1,128], index: 6, kind: input, shape index: {}]   ;;  %s3765_s7 = inlined_call_operand.vmem [shape: f32[16,5], index: 7, kind: input, shape index: {}]   ;;  %s3766_s8 = inlined_call_operand.vmem [shape: f32[16,5], index: 8, kind: input, shape index: {}]   ;;  %s3767_s9 = inlined_call_operand.vmem [shape: f32[1,5], index: 9, kind: input, shape index: {}]   ;;  %s3768_s10 = inlined_call_operand.vmem [shape: f32[1,5], index: 10, kind: input, shape index: {}]   ;;  %s3769_s11 = inlined_call_operand.vmem [shape: f32[1,5], index: 11, kind: input, shape index: {}]   ;;  %s3770_s12 = inlined_call_operand.vmem [shape: f32[5,5], index: 12, kind: input, shape index: {}]   ;;  %s3771_s13 = inlined_call_operand.hbm [shape: f32[1,1], index: 13, kind: output, shape index: {}]  }
   0x1   :  { %v76_v0 = vld [vmem:[%s3762_s4 + $0x18] sm:$0xff]  ;;  %v75_v1 = vld [vmem:[%s3762_s4 + $0x10] sm:$0xff]  ;;  %2624 = vmatprep.subr.mxu1 %v2931_v3  ;;  %v74_v5 = vld [vmem:[%s3762_s4 + $0x8] sm:$0xff] }
   0x2   :  { %v3017_v2 = vld [vmem:[%s3763_s5 + $0x18] sm:$0xff]  ;;  %2604 = vmatprep.subr.mxu0 %v76_v0  ;;  %v3023_v4 = vld [vmem:[%s3763_s5 + $0x10] sm:$0xff]  ;;  %v65_v6 = vld [vmem:[%s3758_s0] sm:$0xff] }
   0x3   :  { %2605 = vmatpush3.msra.mxu0 %v76_v0  ;;  %2625 = vmatpush3.msra.mxu1 %v3017_v2 }
   0x4   :  { %2606 = vmatprep.subr.mxu0 %v75_v1  ;;  %2626 = vmatprep.subr.mxu1 %v2931_v3 }
   0x5   :  { %18 = vsyncpa [#allocation3], 0  ;;  %2607 = vmatpush3.msra.mxu0 %v75_v1  ;;  %2627 = vmatpush3.msra.mxu1 %v3023_v4  ;;  %v73_v7 = vld [vmem:[%s3762_s4] sm:$0xff]  ;;  %v3040_v8 = vld [vmem:[%s3763_s5 + $0x8] sm:$0xff]  ;;  %vm2932_vm1 = vmmov 0   ;;  %s2933_s28 = smov 32  }
   0x6   :  { %2608 = vmatprep.subr.mxu0 %v74_v5  ;;  %2628 = vmatprep.subr.mxu1 %v2931_v3  ;;  %v66_v9 = vld [vmem:[%s3758_s0 + $0x8] sm:$0xff]  ;;  %v3050_v10 = vld [vmem:[%s3763_s5] sm:$0xff]  ;;  %v67_v46 = vld [vmem:[%s3758_s0 + $0x10] sm:$0xff]  ;;  %vm1033_vm2 = vcmask 130048   ;;  %s2935_s29 = smov 48   ;;  %vm1747_vm3 = vcmask 36864  }
   0x7   :  { %2609 = vmatpush3.msra.mxu0 %v74_v5  ;;  %2612 = vmatprep.mubr.msk.f32.mxu0 %vm84_vm0, %v65_v6  ;;  %v3082_v12 = vld [vmem:[%s3764_s6] ss:$0 sm:$0xff]  ;;  %s2934_s6 = smov 64   ;;  %v68_v47 = vld [vmem:[%s3758_s0 + $0x18] sm:$0xff]  ;;  %v70_v49 = vld [vmem:[%s3758_s0 + $0x28] sm:$0xff]  ;;  %vm1410_vm4 = vcmask 39936  }
   0x8   :  { %2610 = vmatprep.subr.mxu0 %v73_v7  ;;  %2629 = vmatpush3.msra.mxu1 %v3040_v8  ;;  %v69_v48 = vld [vmem:[%s3758_s0 + $0x20] sm:$0xff]  ;;  %v71_v50 = vld [vmem:[%s3758_s0 + $0x30] sm:$0xff]  ;;  %v72_v51 = vld [vmem:[%s3758_s0 + $0x38] sm:$0xff]  ;;  %vm1553_vm5 = vcmask 1044480  }
   0x9   :  { %2611 = vmatpush3.msra.mxu0 %v73_v7  ;;  %2630 = vmatprep.subr.mxu1 %v2931_v3 }
   0xa   :  { %2613 = vmatmul.mubr.msk.f32.vlgmr.msra.gmra.mxu0 %vm84_vm0, %v66_v9  ;;  %2631 = vmatpush3.msra.mxu1 %v3050_v10 }
   0xb   :  { %2632 = vmatprep.mubr.msk.f32.mxu1 %vm2932_vm1, %v2931_v3  ;;  %2635 = vmatprep.subr.mxu1 %v2931_v3 }
   0xc   :  { %2633 = vmatmul.mubr.f32.vlgmr.msra.gmra.mxu1 %v2931_v3  ;;  %2646 = vmatprep.subr.mxu0 %v2931_v3 }
   0xd   :  { %2636 = vmatpush3.msra.mxu1 %v3017_v2  ;;  %2643 = vmatprep.mubr.msk.f32.mxu1 %vm2932_vm1, %v2931_v3 }
   0xe   :  { %2637 = vmatprep.subr.mxu1 %v2931_v3  ;;  %2647 = vmatpush3.msra.mxu0 %v3017_v2 }
   0xf   :  { %2638 = vmatpush3.msra.mxu1 %v3023_v4  ;;  %2648 = vmatprep.subr.mxu0 %v2931_v3 }
  0x10   :  { %2639 = vmatprep.subr.mxu1 %v2931_v3  ;;  %2649 = vmatpush3.msra.mxu0 %v3023_v4 }
  0x11   :  { %2640 = vmatpush3.msra.mxu1 %v3040_v8  ;;  %2650 = vmatprep.subr.mxu0 %v2931_v3 }
  0x12   :  { %2641 = vmatprep.subr.mxu1 %v2931_v3  ;;  %2651 = vmatpush3.msra.mxu0 %v3040_v8 }
  0x13   :  { %2642 = vmatpush3.msra.mxu1 %v3050_v10  ;;  %2652 = vmatprep.subr.mxu0 %v2931_v3 }
  0x14   :  { %2653 = vmatpush3.msra.mxu0 %v3050_v10  ;;  %2657 = vmatprep.subr.mxu1 %v2931_v3 }
  0x15   :  { %2668 = vmatprep.subr.mxu0 %v2931_v3  ;;  %2615 = vmatprep.mubr.msk.f32.mxu0 %vm84_vm0, %v67_v46 }
  0x16   :  { %2616 = vmatmul.mubr.msk.f32.gmra.mxu0 %vm84_vm0, %v68_v47 }
  0x17   :  { %2618 = vmatprep.mubr.msk.f32.mxu0 %vm84_vm0, %v69_v48 }
  0x1a   :  { %2619 = vmatmul.mubr.msk.f32.gmra.mxu0 %vm84_vm0, %v70_v49 }
  0x1b   :  { %2621 = vmatprep.mubr.msk.f32.mxu0 %vm84_vm0, %v71_v50 }
  0x1e   :  { %2622 = vmatmul.mubr.msk.f32.gmra.mxu0 %vm84_vm0, %v72_v51 }
  0x1f   :  { %2654 = vmatprep.mubr.msk.f32.mxu0 %vm2932_vm1, %v2931_v3 }
  0xca   :  { %v2614_v11 = vpop.f32.mrf.mxu0 }
  0xcb   :  { %v181_v32 = vadd.f32 %v2614_v11, %v3082_v12 }
  0xcc   :  { %v175_v13 = vpop.f32.mrf.mxu0  ;;  %v283_v14 = vpop.f32.mrf.mxu1 }
  0xcd   :  { %v176_v15 = vadd.f32 %v3082_v12, %v175_v13 }
  0xce   :  { %v2634_v16 = vpop.f32.mrf.mxu1 }
  0xcf   :  { %v287_v17 = vadd.f32 %v283_v14, %v176_v15 }
  0xd1   :  { %2811 = vtanh.f32 %v287_v17  ;;  %v2446_v19 = vmul.f32 -1.442695, %v287_v17 }
  0xd3   :  { %2813 = vpow2.f32 %v2446_v19 }
  0xd6   :  { %v2617_v56 = vpop.f32.mrf.mxu0 }
  0xd8   :  { %v185_v57 = vpop.f32.mrf.mxu0 }
  0xd9   :  { %v186_v62 = vadd.f32 %v3082_v12, %v185_v57 }
  0xda   :  { %v3154_v58 = vpop.f32.mrf.mxu0 }
  0xdc   :  { %v3156_v59 = vpop.f32.mrf.mxu0 }
  0xde   :  { %v2812_v18 = vpop.eup %2811  ;;  %v3158_v60 = vpop.f32.mrf.mxu0 }
  0xdf   :  { %297 = vrot.lane.b32.xlu0 %v2812_v18, %s2933_s28 }
  0xe0   :  { %v2814_v20 = vpop.eup %2813  ;;  %v3160_v61 = vpop.f32.mrf.mxu0 }
  0xe1   :  { %v291_v21 = vadd.f32 1.0, %v2814_v20 }
  0xe3   :  { %2815 = vrcp.f32 %v291_v21 }
  0xf0   :  { %v2816_v22 = vpop.eup %2815 }
  0xf1   :  { %v295_v25 = vmul.f32 0.0, %v2816_v22 }
 0x151   :  { %v298_v23 = vpop.permute.xlu0 %297 }
 0x152   :  { %v300_v24 = vmul.f32 %v2816_v22, %v298_v23 }
 0x154   :  { %302 = vrot.lane.b32.xlu0 %v300_v24, %s2933_s28 }
 0x1c6   :  { %v303_v26 = vpop.permute.xlu0 %302 }
 0x1c7   :  { %v305_v27 = vadd.f32 %v303_v26, %v295_v25 }
 0x1c9   :  { %2817 = vtanh.f32 %v305_v27 }
 0x1d6   :  { %v2818_v28 = vpop.eup %2817 }
 0x1d7   :  { %308 = vrot.lane.b32.xlu1 %v2818_v28, %s2933_s28 }
 0x249   :  { %v309_v29 = vpop.permute.xlu1 %308 }
 0x24a   :  { %v3088_v30 = vmul.f32 %v2816_v22, %v309_v29  ;;  %v191_v22 = vadd.f32 %v2617_v56, %v3082_v12 }
 0x24c   :  { %313 = vrot.lane.b32.xlu1 %v3088_v30, %s2934_s6 }
 0x2be   :  { %v3092_v31 = vpop.permute.xlu1 %313 }
 0x2bf   :  { %2644 = vmatmul.mubr.msk.f32.vlgmr.msra.gmra.mxu1 %vm84_vm0, %v3092_v31 }
 0x2c0   :  { %2658 = vmatpush3.msra.mxu1 %v3017_v2  ;;  %2665 = vmatprep.mubr.msk.f32.mxu1 %vm2932_vm1, %v2931_v3 }
 0x2c1   :  { %2659 = vmatprep.subr.mxu1 %v2931_v3 }
 0x2c2   :  { %2660 = vmatpush3.msra.mxu1 %v3023_v4 }
 0x2c3   :  { %2661 = vmatprep.subr.mxu1 %v2931_v3 }
 0x2c4   :  { %2662 = vmatpush3.msra.mxu1 %v3040_v8 }
 0x2c5   :  { %2663 = vmatprep.subr.mxu1 %v2931_v3 }
 0x2c6   :  { %2664 = vmatpush3.msra.mxu1 %v3050_v10 }
 0x2c7   :  { %2679 = vmatprep.subr.mxu1 %v2931_v3 }
 0x37f   :  { %v383_v33 = vpop.f32.mrf.mxu1 }
 0x380   :  { %v387_v34 = vadd.f32 %v383_v33, %v181_v32 }
 0x381   :  { %v2645_v35 = vpop.f32.mrf.mxu1 }
 0x382   :  { %2819 = vtanh.f32 %v387_v34  ;;  %v2448_v37 = vmul.f32 -1.442695, %v387_v34 }
 0x384   :  { %2821 = vpow2.f32 %v2448_v37 }
 0x38f   :  { %v2820_v36 = vpop.eup %2819 }
 0x390   :  { %397 = vrot.lane.b32.xlu0 %v2820_v36, %s2933_s28 }
 0x391   :  { %v2822_v38 = vpop.eup %2821 }
 0x392   :  { %v391_v39 = vadd.f32 1.0, %v2822_v38 }
 0x394   :  { %2823 = vrcp.f32 %v391_v39 }
 0x3a1   :  { %v2824_v40 = vpop.eup %2823 }
 0x3a2   :  { %v395_v43 = vmul.f32 %v2824_v40, %v305_v27 }
 0x402   :  { %v398_v41 = vpop.permute.xlu0 %397 }
 0x403   :  { %v400_v42 = vmul.f32 %v2824_v40, %v398_v41 }
 0x405   :  { %402 = vrot.lane.b32.xlu1 %v400_v42, %s2933_s28  ;;  %v196_v42 = vadd.f32 %v3082_v12, %v3156_v59 }
 0x477   :  { %v403_v44 = vpop.permute.xlu1 %402 }
 0x478   :  { %v405_v45 = vadd.f32 %v403_v44, %v395_v43 }
 0x47a   :  { %2825 = vtanh.f32 %v405_v45 }
 0x487   :  { %v2826_v52 = vpop.eup %2825 }
 0x488   :  { %408 = vrot.lane.b32.xlu0 %v2826_v52, %s2933_s28 }
 0x4fa   :  { %v409_v53 = vpop.permute.xlu0 %408 }
 0x4fb   :  { %v3136_v54 = vmul.f32 %v2824_v40, %v409_v53 }
 0x4fd   :  { %413 = vrot.lane.b32.xlu1 %v3136_v54, %s2934_s6 }
 0x56f   :  { %v3140_v55 = vpop.permute.xlu1 %413 }
 0x570   :  { %2655 = vmatmul.mubr.msk.f32.vlgmr.msra.gmra.mxu0 %vm84_vm0, %v3140_v55 }
 0x571   :  { %2669 = vmatpush3.msra.mxu0 %v3017_v2  ;;  %2676 = vmatprep.mubr.msk.f32.mxu0 %vm2932_vm1, %v2931_v3 }
 0x572   :  { %2670 = vmatprep.subr.mxu0 %v2931_v3 }
 0x573   :  { %2671 = vmatpush3.msra.mxu0 %v3023_v4 }
 0x574   :  { %2672 = vmatprep.subr.mxu0 %v2931_v3 }
 0x575   :  { %2673 = vmatpush3.msra.mxu0 %v3040_v8 }
 0x576   :  { %2674 = vmatprep.subr.mxu0 %v2931_v3 }
 0x577   :  { %2675 = vmatpush3.msra.mxu0 %v3050_v10 }
 0x578   :  { %2690 = vmatprep.subr.mxu0 %v2931_v3 }
 0x630   :  { %v483_v63 = vpop.f32.mrf.mxu0 }
 0x631   :  { %v487_v0 = vadd.f32 %v483_v63, %v186_v62 }
 0x632   :  { %v2656_v1 = vpop.f32.mrf.mxu0 }
 0x633   :  { %2827 = vtanh.f32 %v487_v0  ;;  %v2450_v6 = vmul.f32 -1.442695, %v487_v0  ;;  %v201_v1 = vadd.f32 %v3154_v58, %v3082_v12 }
 0x635   :  { %2829 = vpow2.f32 %v2450_v6 }
 0x640   :  { %v2828_v5 = vpop.eup %2827 }
 0x641   :  { %497 = vrot.lane.b32.xlu0 %v2828_v5, %s2933_s28 }
 0x642   :  { %v2830_v7 = vpop.eup %2829 }
 0x643   :  { %v491_v9 = vadd.f32 1.0, %v2830_v7 }
 0x645   :  { %2831 = vrcp.f32 %v491_v9 }
 0x652   :  { %v2832_v11 = vpop.eup %2831 }
 0x653   :  { %v495_v15 = vmul.f32 %v2832_v11, %v405_v45 }
 0x6b3   :  { %v498_v13 = vpop.permute.xlu0 %497 }
 0x6b4   :  { %v500_v14 = vmul.f32 %v2832_v11, %v498_v13 }
 0x6b6   :  { %502 = vrot.lane.b32.xlu1 %v500_v14, %s2933_s28 }
 0x728   :  { %v503_v16 = vpop.permute.xlu1 %502 }
 0x729   :  { %v505_v17 = vadd.f32 %v503_v16, %v495_v15 }
 0x72b   :  { %2833 = vtanh.f32 %v505_v17 }
 0x738   :  { %v2834_v18 = vpop.eup %2833 }
 0x739   :  { %508 = vrot.lane.b32.xlu0 %v2834_v18, %s2933_s28 }
 0x7ab   :  { %v509_v19 = vpop.permute.xlu0 %508 }
 0x7ac   :  { %v3166_v20 = vmul.f32 %v2832_v11, %v509_v19 }
 0x7ae   :  { %513 = vrot.lane.b32.xlu1 %v3166_v20, %s2934_s6 }
 0x820   :  { %v3170_v21 = vpop.permute.xlu1 %513 }
 0x821   :  { %2666 = vmatmul.mubr.msk.f32.vlgmr.msra.gmra.mxu1 %vm84_vm0, %v3170_v21 }
 0x822   :  { %2680 = vmatpush3.msra.mxu1 %v3017_v2  ;;  %2687 = vmatprep.mubr.msk.f32.mxu1 %vm2932_vm1, %v2931_v3 }
 0x823   :  { %2681 = vmatprep.subr.mxu1 %v2931_v3 }
 0x824   :  { %2682 = vmatpush3.msra.mxu1 %v3023_v4 }
 0x825   :  { %2683 = vmatprep.subr.mxu1 %v2931_v3 }
 0x826   :  { %2684 = vmatpush3.msra.mxu1 %v3040_v8 }
 0x827   :  { %2685 = vmatprep.subr.mxu1 %v2931_v3 }
 0x828   :  { %2686 = vmatpush3.msra.mxu1 %v3050_v10 }
 0x829   :  { %2701 = vmatprep.subr.mxu1 %v2931_v3 }
 0x8e1   :  { %v583_v23 = vpop.f32.mrf.mxu1 }
 0x8e2   :  { %v587_v24 = vadd.f32 %v583_v23, %v191_v22  ;;  %v206_v22 = vadd.f32 %v3082_v12, %v3160_v61 }
 0x8e3   :  { %v2667_v25 = vpop.f32.mrf.mxu1 }
 0x8e4   :  { %2835 = vtanh.f32 %v587_v24  ;;  %v2452_v27 = vmul.f32 -1.442695, %v587_v24 }
 0x8e6   :  { %2837 = vpow2.f32 %v2452_v27 }
 0x8f1   :  { %v2836_v26 = vpop.eup %2835 }
 0x8f2   :  { %597 = vrot.lane.b32.xlu0 %v2836_v26, %s2933_s28 }
 0x8f3   :  { %v2838_v28 = vpop.eup %2837 }
 0x8f4   :  { %v591_v29 = vadd.f32 1.0, %v2838_v28 }
 0x8f6   :  { %2839 = vrcp.f32 %v591_v29 }
 0x903   :  { %v2840_v32 = vpop.eup %2839 }
 0x904   :  { %v595_v35 = vmul.f32 %v2840_v32, %v505_v17 }
 0x964   :  { %v598_v33 = vpop.permute.xlu0 %597 }
 0x965   :  { %v600_v34 = vmul.f32 %v2840_v32, %v598_v33 }
 0x967   :  { %602 = vrot.lane.b32.xlu1 %v600_v34, %s2933_s28 }
 0x9d9   :  { %v603_v36 = vpop.permute.xlu1 %602 }
 0x9da   :  { %v605_v37 = vadd.f32 %v603_v36, %v595_v35 }
 0x9dc   :  { %2841 = vtanh.f32 %v605_v37 }
 0x9e9   :  { %v2842_v38 = vpop.eup %2841 }
 0x9ea   :  { %608 = vrot.lane.b32.xlu0 %v2842_v38, %s2933_s28  ;;  %v1013_v38 = vld [vmem:[%s3765_s7 + $0x8] sm:$0xff] }
 0xa5c   :  { %v609_v39 = vpop.permute.xlu0 %608 }
 0xa5d   :  { %v3188_v40 = vmul.f32 %v2840_v32, %v609_v39 }
 0xa5f   :  { %613 = vrot.lane.b32.xlu1 %v3188_v40, %s2934_s6 }
 0xad1   :  { %v3192_v41 = vpop.permute.xlu1 %613 }
 0xad2   :  { %2677 = vmatmul.mubr.msk.f32.vlgmr.msra.gmra.mxu0 %vm84_vm0, %v3192_v41 }
 0xad3   :  { %2691 = vmatpush3.msra.mxu0 %v3017_v2  ;;  %2698 = vmatprep.mubr.msk.f32.mxu0 %vm2932_vm1, %v2931_v3 }
 0xad4   :  { %2692 = vmatprep.subr.mxu0 %v2931_v3 }
 0xad5   :  { %2693 = vmatpush3.msra.mxu0 %v3023_v4 }
 0xad6   :  { %2694 = vmatprep.subr.mxu0 %v2931_v3 }
 0xad7   :  { %2695 = vmatpush3.msra.mxu0 %v3040_v8 }
 0xad8   :  { %2696 = vmatprep.subr.mxu0 %v2931_v3 }
 0xad9   :  { %2697 = vmatpush3.msra.mxu0 %v3050_v10 }
 0xb92   :  { %v683_v43 = vpop.f32.mrf.mxu0 }
 0xb93   :  { %v687_v44 = vadd.f32 %v683_v43, %v196_v42 }
 0xb94   :  { %v2678_v45 = vpop.f32.mrf.mxu0 }
 0xb95   :  { %2843 = vtanh.f32 %v687_v44  ;;  %v2454_v47 = vmul.f32 -1.442695, %v687_v44  ;;  %v1012_v44 = vld [vmem:[%s3765_s7] sm:$0xff] }
 0xb97   :  { %2845 = vpow2.f32 %v2454_v47 }
 0xba2   :  { %v2844_v46 = vpop.eup %2843 }
 0xba3   :  { %697 = vrot.lane.b32.xlu0 %v2844_v46, %s2933_s28 }
 0xba4   :  { %v2846_v48 = vpop.eup %2845 }
 0xba5   :  { %v691_v49 = vadd.f32 1.0, %v2846_v48 }
 0xba7   :  { %2847 = vrcp.f32 %v691_v49 }
 0xbb4   :  { %v2848_v50 = vpop.eup %2847 }
 0xbb5   :  { %v695_v53 = vmul.f32 %v2848_v50, %v605_v37 }
 0xc15   :  { %v698_v51 = vpop.permute.xlu0 %697 }
 0xc16   :  { %v700_v52 = vmul.f32 %v2848_v50, %v698_v51 }
 0xc18   :  { %702 = vrot.lane.b32.xlu1 %v700_v52, %s2933_s28 }
 0xc8a   :  { %v703_v56 = vpop.permute.xlu1 %702 }
 0xc8b   :  { %v705_v57 = vadd.f32 %v703_v56, %v695_v53  ;;  %v1014_v56 = vld [vmem:[%s3766_s8] sm:$0xff] }
 0xc8d   :  { %2849 = vtanh.f32 %v705_v57 }
 0xc9a   :  { %v2850_v59 = vpop.eup %2849 }
 0xc9b   :  { %708 = vrot.lane.b32.xlu0 %v2850_v59, %s2933_s28 }
 0xd0d   :  { %v709_v62 = vpop.permute.xlu0 %708 }
 0xd0e   :  { %v3210_v63 = vmul.f32 %v2848_v50, %v709_v62 }
 0xd10   :  { %713 = vrot.lane.b32.xlu1 %v3210_v63, %s2934_s6 }
 0xd82   :  { %v3214_v0 = vpop.permute.xlu1 %713 }
 0xd83   :  { %2688 = vmatmul.mubr.msk.f32.vlgmr.msra.gmra.mxu1 %vm84_vm0, %v3214_v0 }
 0xd84   :  { %2702 = vmatpush3.msra.mxu1 %v3017_v2  ;;  %2709 = vmatprep.mubr.msk.f32.mxu1 %vm2932_vm1, %v2931_v3 }
 0xd85   :  { %2703 = vmatprep.subr.mxu1 %v2931_v3 }
 0xd86   :  { %2704 = vmatpush3.msra.mxu1 %v3023_v4 }
 0xd87   :  { %2705 = vmatprep.subr.mxu1 %v2931_v3 }
 0xd88   :  { %2706 = vmatpush3.msra.mxu1 %v3040_v8 }
 0xd89   :  { %2707 = vmatprep.subr.mxu1 %v2931_v3 }
 0xd8a   :  { %2708 = vmatpush3.msra.mxu1 %v3050_v10 }
 0xd8b   :  { %2728 = vmatprep.subr.mxu1 %v1013_v38 }
 0xe43   :  { %v783_v5 = vpop.f32.mrf.mxu1 }
 0xe44   :  { %v787_v2 = vadd.f32 %v783_v5, %v201_v1 }
 0xe45   :  { %v2689_v6 = vpop.f32.mrf.mxu1 }
 0xe46   :  { %2851 = vtanh.f32 %v787_v2  ;;  %v2456_v9 = vmul.f32 -1.442695, %v787_v2  ;;  %v1295_v2 = vld [vmem:[%s3770_s12] sm:$0x1f] }
 0xe47   :  { %v1748_v6 = vsel %vm1747_vm3, %v1295_v2, -inf }
 0xe48   :  { %2853 = vpow2.f32 %v2456_v9 }
 0xe53   :  { %v2852_v7 = vpop.eup %2851 }
 0xe54   :  { %797 = vrot.lane.b32.xlu0 %v2852_v7, %s2933_s28  ;;  %v1749_v7 = vrot.slane %v1748_v6, 4 }
 0xe55   :  { %v2854_v4 = vpop.eup %2853 }
 0xe56   :  { %v791_v11 = vadd.f32 1.0, %v2854_v4  ;;  %v1750_v9 = vmax.f32 %v1748_v6, %v1749_v7 }
 0xe58   :  { %2855 = vrcp.f32 %v791_v11  ;;  %v1751_v4 = vrot.slane %v1750_v9, 2 }
 0xe5a   :  { %v1752_v11 = vmax.f32 %v1750_v9, %v1751_v4 }
 0xe65   :  { %v2856_v8 = vpop.eup %2855 }
 0xe66   :  { %v795_v10 = vmul.f32 %v2856_v8, %v705_v57 }
 0xec6   :  { %v798_v13 = vpop.permute.xlu0 %797 }
 0xec7   :  { %v800_v14 = vmul.f32 %v2856_v8, %v798_v13 }
 0xec9   :  { %802 = vrot.lane.b32.xlu1 %v800_v14, %s2933_s28 }
 0xf3b   :  { %v803_v15 = vpop.permute.xlu1 %802 }
 0xf3c   :  { %v805_v58 = vadd.f32 %v803_v15, %v795_v10 }
 0xf3e   :  { %2857 = vtanh.f32 %v805_v58 }
 0xf4b   :  { %v2858_v16 = vpop.eup %2857 }
 0xf4c   :  { %808 = vrot.lane.b32.xlu0 %v2858_v16, %s2933_s28 }
 0xfbe   :  { %v809_v17 = vpop.permute.xlu0 %808 }
 0xfbf   :  { %v3232_v18 = vmul.f32 %v2856_v8, %v809_v17  ;;  %v1753_v8 = vrot.slane %v1752_v11, 1 }
 0xfc1   :  { %813 = vrot.lane.b32.xlu1 %v3232_v18, %s2934_s6  ;;  %v3286_v13 = vmax.f32 %v1752_v11, %v1753_v8 }
 0xfc3   :  { %v1755_v15 = vsub.f32 %v1295_v2, %v3286_v13 }
0x1033   :  { %v814_v19 = vpop.permute.xlu1 %813 }
0x1034   :  { %2699 = vmatmul.mubr.msk.f32.vlgmr.msra.gmra.mxu0 %vm84_vm0, %v814_v19 }
0x10f4   :  { %v883_v23 = vpop.f32.mrf.mxu0 }
0x10f5   :  { %v887_v24 = vadd.f32 %v883_v23, %v206_v22  ;;  %v3297_v22 = vld [vmem:[%s3768_s10] ss:$0 sm:$0xff] }
0x10f6   :  { %v2700_v25 = vpop.f32.mrf.mxu0 }
0x10f7   :  { %2859 = vtanh.f32 %v887_v24  ;;  %v2458_v27 = vmul.f32 -1.442695, %v887_v24  ;;  %v1756_v24 = vmul.f32 1.442695, %v1755_v15 }
0x10f9   :  { %2861 = vpow2.f32 %v2458_v27 }
0x1104   :  { %v2860_v26 = vpop.eup %2859 }
0x1105   :  { %897 = vrot.lane.b32.xlu0 %v2860_v26, %s2933_s28 }
0x1106   :  { %v2862_v28 = vpop.eup %2861 }
0x1107   :  { %v891_v29 = vadd.f32 1.0, %v2862_v28  ;;  %v3316_v28 = vld [vmem:[%s3760_s2 + $0x8] sm:$0xff] }
0x1108   :  { %vm1846_vm6 = vcmp.gt.f32.partialorder %v3316_v28, 0.0 }
0x1109   :  { %2863 = vrcp.f32 %v891_v29  ;;  %v2936_v29 = vmov 0  }
0x110a   :  { %2809 = vset.pattern.permute.xlu0 %v2936_v29  ;;  %2810 = vset.pattern.permute.xlu1 %v2936_v29 }
0x1116   :  { %v2864_v32 = vpop.eup %2863 }
0x1117   :  { %v895_v35 = vmul.f32 %v2864_v32, %v805_v58 }
0x1177   :  { %v898_v33 = vpop.permute.xlu0 %897 }
0x1178   :  { %v900_v34 = vmul.f32 %v2864_v32, %v898_v33 }
0x117a   :  { %902 = vrot.lane.b32.xlu1 %v900_v34, %s2933_s28 }
0x11ec   :  { %v903_v36 = vpop.permute.xlu1 %902 }
0x11ed   :  { %v905_v61 = vadd.f32 %v903_v36, %v895_v35 }
0x11ef   :  { %2865 = vtanh.f32 %v905_v61 }
0x11fc   :  { %v2866_v37 = vpop.eup %2865 }
0x11fd   :  { %908 = vrot.lane.b32.xlu0 %v2866_v37, %s2933_s28 }
0x126f   :  { %v909_v39 = vpop.permute.xlu0 %908 }
0x1270   :  { %v911_v42 = vmul.f32 %v2864_v32, %v909_v39  ;;  %v1847_v32 = vsel %vm1846_vm6, 1, %v2936_v29 }
0x1272   :  { %913 = vrot.lane.b32.xlu1 %v911_v42, %s2934_s6 }
0x12e4   :  { %v914_v43 = vpop.permute.xlu1 %913 }
0x12e5   :  { %2710 = vmatmul.mubr.msk.f32.vlgmr.msra.gmra.mxu1 %vm84_vm0, %v914_v43 }
0x12e6   :  { %2729 = vmatpush3.msra.mxu1 %v1013_v38  ;;  %2732 = vmatprep.mubr.msk.f32.mxu1 %vm1033_vm2, %v3092_v31  ;;  %v211_v31 = vadd.f32 %v3158_v60, %v3082_v12  ;;  %v1015_v60 = vld [vmem:[%s3766_s8 + $0x8] sm:$0xff] }
0x12e7   :  { %2730 = vmatprep.subr.mxu1 %v1012_v44  ;;  %2712 = vmatprep.subr.mxu0 %v1015_v60 }
0x12e8   :  { %2731 = vmatpush3.msra.mxu1 %v1012_v44  ;;  %2713 = vmatpush3.msra.mxu0 %v1015_v60 }
0x12e9   :  { %2733 = vmatmul.mubr.msk.f32.vlgmr.msra.gmra.mxu1 %vm1033_vm2, %v3140_v55  ;;  %2767 = vmatprep.subr.mxu1 %v2931_v3 }
0x12ea   :  { %2735 = vmatprep.mubr.msk.f32.mxu1 %vm1033_vm2, %v3170_v21  ;;  %2714 = vmatprep.subr.mxu0 %v1014_v56 }
0x12eb   :  { %2715 = vmatpush3.msra.mxu0 %v1014_v56 }
0x12ec   :  { %2744 = vmatprep.subr.mxu0 %v2931_v3 }
0x12ed   :  { %2736 = vmatmul.mubr.msk.f32.gmra.mxu1 %vm1033_vm2, %v3192_v41 }
0x12ee   :  { %2738 = vmatprep.mubr.msk.f32.mxu1 %vm1033_vm2, %v3214_v0 }
0x12f1   :  { %2739 = vmatmul.mubr.msk.f32.gmra.mxu1 %vm1033_vm2, %v814_v19  ;;  %v3292_v19 = vld [vmem:[%s3767_s9] ss:$0 sm:$0xff] }
0x12f2   :  { %2741 = vmatprep.mubr.msk.f32.mxu1 %vm1033_vm2, %v914_v43 }
0x13a5   :  { %v983_v45 = vpop.f32.mrf.mxu1 }
0x13a6   :  { %v987_v55 = vadd.f32 %v983_v45, %v211_v31 }
0x13a7   :  { %v2711_v46 = vpop.f32.mrf.mxu1 }
0x13a8   :  { %2867 = vtanh.f32 %v987_v55  ;;  %v2460_v21 = vmul.f32 -1.442695, %v987_v55 }
0x13a9   :  { %v2734_v14 = vpop.f32.mrf.mxu1 }
0x13aa   :  { %2869 = vpow2.f32 %v2460_v21 }
0x13ab   :  { %v1239_v58 = vpop.f32.mrf.mxu1 }
0x13b5   :  { %v2868_v47 = vpop.eup %2867 }
0x13b6   :  { %997 = vrot.lane.b32.xlu0 %v2868_v47, %s2933_s28 }
0x13b7   :  { %v2870_v41 = vpop.eup %2869 }
0x13b8   :  { %v991_v48 = vadd.f32 1.0, %v2870_v41 }
0x13ba   :  { %2871 = vrcp.f32 %v991_v48 }
0x13c7   :  { %v2872_v49 = vpop.eup %2871 }
0x13c8   :  { %v995_v52 = vmul.f32 %v2872_v49, %v905_v61  ;;  %v3329_v61 = vpop.f32.mrf.mxu1 }
0x13ca   :  { %v1249_v37 = vpop.f32.mrf.mxu1 }
0x13cc   :  { %v3331_v38 = vpop.f32.mrf.mxu1 }
0x13ce   :  { %v3333_v39 = vpop.f32.mrf.mxu1 }
0x1428   :  { %v998_v50 = vpop.permute.xlu0 %997 }
0x1429   :  { %v1000_v51 = vmul.f32 %v2872_v49, %v998_v50 }
0x142b   :  { %1002 = vrot.lane.b32.xlu1 %v1000_v51, %s2933_s28 }
0x149d   :  { %v1003_v53 = vpop.permute.xlu1 %1002 }
0x149e   :  { %v1005_v12 = vadd.f32 %v1003_v53, %v995_v52  ;;  %v3348_v52 = vld [vmem:[%s3760_s2 + $0x18] sm:$0xff] }
0x149f   :  { %vm2028_vm8 = vcmp.gt.f32.partialorder %v3348_v52, 0.0 }
0x14a0   :  { %2873 = vtanh.f32 %v1005_v12  ;;  %v2029_v53 = vsel %vm2028_vm8, 1, %v2936_v29  ;;  %v3357_v12 = vld [vmem:[%s3760_s2 + $0x10] sm:$0xff] }
0x14a1   :  { %2875 = vpow2.f32 %v1756_v24  ;;  %vm1937_vm9 = vcmp.gt.f32.partialorder %v3357_v12, 0.0 }
0x14a2   :  { %v1938_v60 = vsel %vm1937_vm9, 1, %v2936_v29 }
0x14ad   :  { %v2874_v57 = vpop.eup %2873 }
0x14ae   :  { %1008 = vrot.lane.b32.xlu0 %v2874_v57, %s2933_s28  ;;  %v3305_v27 = vpop.eup %2875 }
0x14af   :  { %2768 = vmatpush3.msk.msra.mxu1 %vm1553_vm5, %v3305_v27 }
0x14b0   :  { %2772 = vmatprep.subr.mxu1 %v2931_v3 }
0x14b2   :  { %1019 = vrot.lane.b32.xlu0 %v911_v42, %s2935_s29 }
0x1520   :  { %v1009_v59 = vpop.permute.xlu0 %1008 }
0x1521   :  { %v1011_v62 = vmul.f32 %v2872_v49, %v1009_v59 }
0x1523   :  { %1155 = vrot.lane.b32.xlu0 %v1011_v62, %s2934_s6  ;;  %1017 = vrot.lane.b32.xlu1 %v1011_v62, %s2935_s29 }
0x1524   :  { %v1020_v0 = vpop.permute.xlu0 %1019 }
0x1527   :  { %1849 = vperm.xlu0 %2809, %v1847_v32  }
0x1595   :  { %v1018_v1 = vpop.permute.xlu1 %1017  ;;  %v1156_v5 = vpop.permute.xlu0 %1155 }
0x1596   :  { %2716 = vmatprep.mubr.msk.f32.mxu0 %vm1033_vm2, %v1018_v1  ;;  %2742 = vmatmul.mubr.msk.f32.gmra.mxu1 %vm1033_vm2, %v1156_v5 }
0x1597   :  { %2717 = vmatmul.mubr.msk.f32.vlgmr.msra.gmra.mxu0 %vm1033_vm2, %v1020_v0  ;;  %2769 = vmatprep.mubr.msk.f32.mxu1 %vm2932_vm1, %v2931_v3 }
0x1598   :  { %2745 = vmatpush3.msk.msra.mxu0 %vm1553_vm5, %v1295_v2 }
0x15a2   :  { %v1850_v47 = vpop.permute.xlu0 %1849 }
0x15a3   :  { %vm1851_vm7 = vcmp.eq.s32.totalorder %v1850_v47, 1 }
0x1656   :  { %v3335_v42 = vpop.f32.mrf.mxu1 }
0x1657   :  { %v2718_v10 = vpop.f32.mrf.mxu0 }
0x1658   :  { %v3337_v43 = vpop.f32.mrf.mxu1  ;;  %v1245_v45 = vadd.f32 %v2734_v14, %v2718_v10 }
0x1659   :  { %v1116_v16 = vpop.f32.mrf.mxu0 }
0x165a   :  { %v1240_v17 = vadd.f32 %v1239_v58, %v1116_v16  ;;  %v3340_v55 = vadd.f32 %v3292_v19, %v1245_v45  ;;  %v3377_v16 = vld [vmem:[%s3760_s2 + $0x20] sm:$0xff] }
0x165b   :  { %vm2119_vm11 = vcmp.gt.f32.partialorder %v3377_v16, 0.0 }
0x165c   :  { %v3300_v23 = vadd.f32 %v3292_v19, %v1240_v17  ;;  %v2120_v17 = vsel %vm2119_vm11, 1, %v2936_v29 }
0x165e   :  { %v1758_v25 = vadd.f32 %v3297_v22, %v3300_v23 }
0x1660   :  { %v1759_v26 = vsel %vm1410_vm4, %v1758_v25, -inf }
0x1661   :  { %1760 = vmax.xlane.f32.xlu1 %v1759_v26 }
0x1672   :  { %1021 = vrot.lane.b32.xlu1 %v3232_v18, %s2935_s29 }
0x1676   :  { %1940 = vperm.xlu1 %2810, %v1938_v60  }
0x16ea   :  { %v1761_v33 = vpop.xlane.xlu1 %1760 }
0x16eb   :  { %v1762_v34 = vsub.f32 %v1758_v25, %v1761_v33  ;;  %v1765_v46 = vadd.f32 %v1761_v33, %v3340_v55 }
0x16ed   :  { %v1763_v35 = vmul.f32 1.442695, %v1762_v34  ;;  %v1766_v41 = vadd.f32 %v1765_v46, %v3286_v13 }
0x16ee   :  { %v1022_v36 = vpop.permute.xlu1 %1021 }
0x16ef   :  { %2877 = vpow2.f32 %v1763_v35  ;;  %2719 = vmatprep.mubr.msk.f32.mxu0 %vm1033_vm2, %v1022_v36 }
0x16f2   :  { %v1941_v4 = vpop.permute.xlu1 %1940 }
0x16f3   :  { %vm1942_vm10 = vcmp.eq.s32.totalorder %v1941_v4, 1 }
0x16fc   :  { %v2878_v18 = vpop.eup %2877 }
0x16fd   :  { %2770 = vmatmul.mubr.msk.f32.vlgmr.msra.gmra.mxu1 %vm1410_vm4, %v2878_v18 }
0x16fe   :  { %2773 = vmatpush3.msk.msra.mxu1 %vm1553_vm5, %v3305_v27  ;;  %2774 = vmatprep.mubr.msk.f32.mxu1 %vm2932_vm1, %v2931_v3 }
0x16ff   :  { %2777 = vmatprep.subr.mxu1 %v2931_v3 }
0x17bd   :  { %v1839_v44 = vpop.f32.mrf.mxu1 }
0x17be   :  { %2879 = vlog2.f32 %v1839_v44 }
0x17bf   :  { %v2771_v31 = vpop.f32.mrf.mxu1 }
0x17cb   :  { %v2880_v21 = vpop.eup %2879 }
0x17cc   :  { %v1844_v48 = vmul.f32 0.6931472, %v2880_v21 }
0x17ce   :  { %v1845_v49 = vadd.f32 %v1844_v48, %v1766_v41 }
0x17d0   :  { %v1852_v50 = vsel %vm1851_vm7, %v1845_v49, %v1758_v25 }
0x17d1   :  { %v1853_v51 = vsel %vm1410_vm4, %v1852_v50, -inf }
0x17d2   :  { %1854 = vmax.xlane.f32.xlu0 %v1853_v51 }
0x17e8   :  { %1023 = vrot.lane.b32.xlu0 %v3210_v63, %s2935_s29 }
0x17ec   :  { %2031 = vperm.xlu0 %2809, %v2029_v53  }
0x185b   :  { %v1855_v56 = vpop.xlane.xlu0 %1854 }
0x185c   :  { %v1856_v57 = vsub.f32 %v1852_v50, %v1855_v56 }
0x185e   :  { %v1857_v59 = vmul.f32 1.442695, %v1856_v57 }
0x185f   :  { %v1024_v62 = vpop.permute.xlu0 %1023 }
0x1860   :  { %2881 = vpow2.f32 %v1857_v59  ;;  %2720 = vmatmul.mubr.msk.f32.gmra.mxu0 %vm1033_vm2, %v1024_v62 }
0x1867   :  { %v2032_v44 = vpop.permute.xlu0 %2031 }
0x1868   :  { %vm2033_vm12 = vcmp.eq.s32.totalorder %v2032_v44, 1  ;;  %v1299_v44 = vld [vmem:[%s3759_s1 + $0x8] sm:$0xff] }
0x186d   :  { %v2882_v63 = vpop.eup %2881 }
0x186e   :  { %2775 = vmatmul.mubr.msk.f32.vlgmr.msra.gmra.mxu1 %vm1410_vm4, %v2882_v63 }
0x186f   :  { %2778 = vmatpush3.msk.msra.mxu1 %vm1553_vm5, %v3305_v27  ;;  %2779 = vmatprep.mubr.msk.f32.mxu1 %vm2932_vm1, %v2931_v3 }
0x1870   :  { %2782 = vmatprep.subr.mxu1 %v2931_v3 }
0x1920   :  { %v2721_v0 = vpop.f32.mrf.mxu0 }
0x1921   :  { %v1255_v35 = vadd.f32 %v3329_v61, %v2721_v0  ;;  %v3400_v61 = vld [vmem:[%s3760_s2 + $0x28] sm:$0xff] }
0x1922   :  { %v1126_v1 = vpop.f32.mrf.mxu0  ;;  %vm2210_vm13 = vcmp.gt.f32.partialorder %v3400_v61, 0.0 }
0x1923   :  { %v1250_v6 = vadd.f32 %v1249_v37, %v1126_v1  ;;  %v3392_v36 = vadd.f32 %v3292_v19, %v1255_v35  ;;  %v2211_v41 = vsel %vm2210_vm13, 1, %v2936_v29  ;;  %vm2421_vm13 = vcmask 0  }
0x1925   :  { %v3369_v7 = vadd.f32 %v3292_v19, %v1250_v6 }
0x1927   :  { %v1859_v9 = vadd.f32 %v1855_v56, %v3369_v7 }
0x1929   :  { %v1860_v8 = vadd.f32 %v1859_v9, %v3286_v13 }
0x192e   :  { %v1930_v5 = vpop.f32.mrf.mxu1 }
0x192f   :  { %2883 = vlog2.f32 %v1930_v5 }
0x1930   :  { %v2776_v2 = vpop.f32.mrf.mxu1 }
0x193c   :  { %v2884_v11 = vpop.eup %2883 }
0x193d   :  { %v1935_v14 = vmul.f32 0.6931472, %v2884_v11 }
0x193f   :  { %v1936_v10 = vadd.f32 %v1935_v14, %v1860_v8 }
0x1941   :  { %v1943_v15 = vsel %vm1942_vm10, %v1936_v10, %v1852_v50 }
0x1942   :  { %v1944_v58 = vsel %vm1410_vm4, %v1943_v15, -inf }
0x1943   :  { %1945 = vmax.xlane.f32.xlu1 %v1944_v58 }
0x1954   :  { %1025 = vrot.lane.b32.xlu1 %v3188_v40, %s2935_s29 }
0x1958   :  { %2122 = vperm.xlu1 %2810, %v2120_v17  }
0x19cc   :  { %v1946_v24 = vpop.xlane.xlu1 %1945 }
0x19cd   :  { %v1947_v25 = vsub.f32 %v1943_v15, %v1946_v24  ;;  %v1950_v18 = vadd.f32 %v1946_v24, %v3392_v36 }
0x19cf   :  { %v1948_v26 = vmul.f32 1.442695, %v1947_v25  ;;  %v1951_v31 = vadd.f32 %v1950_v18, %v3286_v13 }
0x19d0   :  { %v1026_v32 = vpop.permute.xlu1 %1025 }
0x19d1   :  { %2885 = vpow2.f32 %v1948_v26  ;;  %2722 = vmatprep.mubr.msk.f32.mxu0 %vm1033_vm2, %v1026_v32 }
0x19d4   :  { %v2123_v1 = vpop.permute.xlu1 %2122 }
0x19d5   :  { %vm2124_vm14 = vcmp.eq.s32.totalorder %v2123_v1, 1 }
0x19de   :  { %v2886_v33 = vpop.eup %2885 }
0x19df   :  { %2780 = vmatmul.mubr.msk.f32.vlgmr.msra.gmra.mxu1 %vm1410_vm4, %v2886_v33 }
0x19e0   :  { %2783 = vmatpush3.msk.msra.mxu1 %vm1553_vm5, %v3305_v27  ;;  %2784 = vmatprep.mubr.msk.f32.mxu1 %vm2932_vm1, %v2931_v3 }
0x19e1   :  { %2787 = vmatprep.subr.mxu1 %v2931_v3 }
0x1a9f   :  { %v2021_v40 = vpop.f32.mrf.mxu1 }
0x1aa0   :  { %2887 = vlog2.f32 %v2021_v40 }
0x1aa1   :  { %v2781_v34 = vpop.f32.mrf.mxu1 }
0x1aad   :  { %v2888_v37 = vpop.eup %2887 }
0x1aae   :  { %v2026_v45 = vmul.f32 0.6931472, %v2888_v37 }
0x1ab0   :  { %v2027_v46 = vadd.f32 %v2026_v45, %v1951_v31  ;;  %v1300_v31 = vld [vmem:[%s3759_s1 + $0x10] sm:$0xff]  ;;  %v1301_v45 = vld [vmem:[%s3759_s1 + $0x18] sm:$0xff] }
0x1ab2   :  { %v2034_v47 = vsel %vm2033_vm12, %v2027_v46, %v1943_v15  ;;  %v1303_v46 = vld [vmem:[%s3759_s1 + $0x28] sm:$0xff] }
0x1ab3   :  { %v2035_v21 = vsel %vm1410_vm4, %v2034_v47, -inf }
0x1ab4   :  { %2036 = vmax.xlane.f32.xlu0 %v2035_v21  ;;  %v1305_v21 = vld [vmem:[%s3759_s1 + $0x38] sm:$0xff] }
0x1aca   :  { %1027 = vrot.lane.b32.xlu0 %v3166_v20, %s2935_s29 }
0x1ace   :  { %2213 = vperm.xlu0 %2809, %v2211_v41   ;;  %v3475_v41 = vld [vmem:[%s3760_s2] sm:$0xff] }
0x1b3d   :  { %v2037_v48 = vpop.xlane.xlu0 %2036 }
0x1b3e   :  { %v2038_v49 = vsub.f32 %v2034_v47, %v2037_v48 }
0x1b40   :  { %v2039_v50 = vmul.f32 1.442695, %v2038_v49 }
0x1b41   :  { %v1028_v51 = vpop.permute.xlu0 %1027 }
0x1b42   :  { %2889 = vpow2.f32 %v2039_v50  ;;  %2723 = vmatmul.mubr.msk.f32.gmra.mxu0 %vm1033_vm2, %v1028_v51 }
0x1b49   :  { %v2214_v33 = vpop.permute.xlu0 %2213 }
0x1b4a   :  { %vm2215_vm0 = vcmp.eq.s32.totalorder %v2214_v33, 1 }
0x1b4f   :  { %v2890_v53 = vpop.eup %2889 }
0x1b50   :  { %2785 = vmatmul.mubr.msk.f32.vlgmr.msra.gmra.mxu1 %vm1410_vm4, %v2890_v53 }
0x1b51   :  { %2788 = vmatpush3.msk.msra.mxu1 %vm1553_vm5, %v3305_v27  ;;  %2789 = vmatprep.mubr.msk.f32.mxu1 %vm2932_vm1, %v2931_v3 }
0x1b52   :  { %2792 = vmatprep.subr.mxu1 %v2931_v3 }
0x1c02   :  { %v2724_v20 = vpop.f32.mrf.mxu0 }
0x1c03   :  { %v1265_v24 = vadd.f32 %v3331_v38, %v2724_v20  ;;  %v1298_v38 = vld [vmem:[%s3759_s1] sm:$0xff]  ;;  %v1296_v20 = vlaneseq }
0x1c04   :  { %v1136_v60 = vpop.f32.mrf.mxu0 }
0x1c05   :  { %v1260_v59 = vadd.f32 %v3333_v39, %v1136_v60  ;;  %v3423_v39 = vld [vmem:[%s3760_s2 + $0x30] sm:$0xff]  ;;  %v3438_v25 = vadd.f32 %v3292_v19, %v1265_v24  ;;  %v3488_v60 = vand.u32 127, %v1296_v20 }
0x1c06   :  { %vm2301_vm15 = vcmp.gt.f32.partialorder %v3423_v39, 0.0 }
0x1c07   :  { %v3415_v62 = vadd.f32 %v3292_v19, %v1260_v59  ;;  %v2302_v11 = vsel %vm2301_vm15, 1, %v2936_v29 }
0x1c09   :  { %v2041_v63 = vadd.f32 %v2037_v48, %v3415_v62  ;;  %v60_v48 = vld [vmem:[%s3761_s3 + $0x18] sm:$0xff] }
0x1c0b   :  { %v2042_v5 = vadd.f32 %v2041_v63, %v3286_v13 }
0x1c10   :  { %v2112_v56 = vpop.f32.mrf.mxu1 }
0x1c11   :  { %2891 = vlog2.f32 %v2112_v56 }
0x1c12   :  { %v2786_v57 = vpop.f32.mrf.mxu1 }
0x1c1e   :  { %v2892_v0 = vpop.eup %2891 }
0x1c1f   :  { %v2117_v2 = vmul.f32 0.6931472, %v2892_v0 }
0x1c21   :  { %v2118_v6 = vadd.f32 %v2117_v2, %v2042_v5 }
0x1c23   :  { %v2125_v9 = vsel %vm2124_vm14, %v2118_v6, %v2034_v47  ;;  %v1304_v47 = vld [vmem:[%s3759_s1 + $0x30] sm:$0xff] }
0x1c24   :  { %v2126_v4 = vsel %vm1410_vm4, %v2125_v9, -inf }
0x1c25   :  { %2127 = vmax.xlane.f32.xlu1 %v2126_v4 }
0x1c36   :  { %1029 = vrot.lane.b32.xlu1 %v3136_v54, %s2935_s29 }
0x1c3a   :  { %2304 = vperm.xlu1 %2810, %v2302_v11  }
0x1cae   :  { %v2128_v8 = vpop.xlane.xlu1 %2127 }
0x1caf   :  { %v2129_v14 = vsub.f32 %v2125_v9, %v2128_v8  ;;  %v2132_v26 = vadd.f32 %v2128_v8, %v3438_v25 }
0x1cb1   :  { %v2130_v10 = vmul.f32 1.442695, %v2129_v14  ;;  %v2133_v40 = vadd.f32 %v2132_v26, %v3286_v13 }
0x1cb2   :  { %v1030_v15 = vpop.permute.xlu1 %1029 }
0x1cb3   :  { %2893 = vpow2.f32 %v2130_v10  ;;  %2725 = vmatprep.mubr.msk.f32.mxu0 %vm1033_vm2, %v1030_v15 }
0x1cc0   :  { %v2894_v58 = vpop.eup %2893 }
0x1cc1   :  { %2790 = vmatmul.mubr.msk.f32.vlgmr.msra.gmra.mxu1 %vm1410_vm4, %v2894_v58 }
0x1cc2   :  { %2793 = vmatpush3.msk.msra.mxu1 %vm1553_vm5, %v3305_v27  ;;  %2794 = vmatprep.mubr.msk.f32.mxu1 %vm2932_vm1, %v2931_v3 }
0x1cc3   :  { %2797 = vmatprep.subr.mxu1 %v2931_v3 }
0x1d81   :  { %v2203_v54 = vpop.f32.mrf.mxu1 }
0x1d82   :  { %2895 = vlog2.f32 %v2203_v54 }
0x1d83   :  { %v2791_v17 = vpop.f32.mrf.mxu1 }
0x1d8f   :  { %v2896_v32 = vpop.eup %2895 }
0x1d90   :  { %v2208_v34 = vmul.f32 0.6931472, %v2896_v32 }
0x1d92   :  { %v2209_v35 = vadd.f32 %v2208_v34, %v2133_v40 }
0x1d94   :  { %v3442_v18 = vsel %vm2215_vm0, %v2209_v35, %v2125_v9 }
0x1d95   :  { %v2217_v37 = vsel %vm1410_vm4, %v3442_v18, -inf }
0x1d96   :  { %2218 = vmax.xlane.f32.xlu0 %v2217_v37 }
0x1dac   :  { %1031 = vrot.lane.b32.xlu0 %v3088_v30, %s2935_s29  ;;  %v1302_v30 = vld [vmem:[%s3759_s1 + $0x20] sm:$0xff] }
0x1db0   :  { %1307 = vperm.xlu0 %2809, %v1298_v38  }
0x1db4   :  { %1310 = vperm.xlu0 %2809, %v1299_v44  }
0x1db8   :  { %1313 = vperm.xlu0 %2809, %v1300_v31  }
0x1dbc   :  { %1316 = vperm.xlu0 %2809, %v1301_v45  }
0x1dc0   :  { %1319 = vperm.xlu0 %2809, %v1302_v30  }
0x1dc4   :  { %1322 = vperm.xlu0 %2809, %v1303_v46  }
0x1dc8   :  { %1325 = vperm.xlu0 %2809, %v1304_v47  }
0x1dcc   :  { %1328 = vperm.xlu0 %2809, %v1305_v21  }
0x1dd0   :  { %1364 = vperm.xlu0 %2809, %v3475_v41  }
0x1dd4   :  { %1477 = vperm.xlu0 %2809, %v60_v48   ;;  %v2305_v48 = vpop.permute.xlu1 %2304 }
0x1e1f   :  { %v3481_v49 = vpop.xlane.xlu0 %2218 }
0x1e20   :  { %v2220_v50 = vsub.f32 %v3442_v18, %v3481_v49 }
0x1e22   :  { %v2221_v51 = vmul.f32 1.442695, %v2220_v50 }
0x1e23   :  { %v1032_v53 = vpop.permute.xlu0 %1031 }
0x1e24   :  { %2897 = vpow2.f32 %v2221_v51  ;;  %2726 = vmatmul.mubr.msk.f32.gmra.mxu0 %vm1033_vm2, %v1032_v53 }
0x1e25   :  { %2746 = vmatprep.mubr.msk.f32.mxu0 %vm2932_vm1, %v2931_v3 }
0x1e2b   :  { %v1308_v56 = vpop.permute.xlu0 %1307 }
0x1e2c   :  { %vm1330_vm3 = vcmp.eq.s32.totalorder %v3488_v60, %v1308_v56 }
0x1e2d   :  { %v3492_v57 = vsel %vm1330_vm3, 1.0, %v2931_v3 }
0x1e2e   :  { %2747 = vmatmul.mubr.msk.f32.vlgmr.msra.gmra.mxu0 %vm1410_vm4, %v3492_v57  ;;  %v1441_v15 = vmul.f32 %v3297_v22, %v3492_v57 }
0x1e2f   :  { %v1311_v59 = vpop.permute.xlu0 %1310  ;;  %2749 = vmatprep.mubr.msk.f32.mxu0 %vm2932_vm1, %v2931_v3 }
0x1e30   :  { %vm1331_vm2 = vcmp.eq.s32.totalorder %v3488_v60, %v1311_v59 }
0x1e31   :  { %v2898_v63 = vpop.eup %2897  ;;  %v3500_v0 = vsel %vm1331_vm2, 1.0, %v2931_v3 }
0x1e32   :  { %2750 = vmatmul.mubr.msk.f32.gmra.mxu0 %vm1410_vm4, %v3500_v0  ;;  %2795 = vmatmul.mubr.msk.f32.vlgmr.msra.gmra.mxu1 %vm1410_vm4, %v2898_v63 }
0x1e33   :  { %v1314_v1 = vpop.permute.xlu0 %1313  ;;  %2752 = vmatprep.mubr.msk.f32.mxu0 %vm2932_vm1, %v2931_v3  ;;  %2798 = vmatpush3.msk.msra.mxu1 %vm1553_vm5, %v3305_v27 }
0x1e34   :  { %vm1332_vm6 = vcmp.eq.s32.totalorder %v3488_v60, %v1314_v1  ;;  %2799 = vmatprep.mubr.msk.f32.mxu1 %vm2932_vm1, %v2931_v3 }
0x1e35   :  { %v3513_v5 = vsel %vm1332_vm6, 1.0, %v2931_v3 }
0x1e36   :  { %2753 = vmatmul.mubr.msk.f32.gmra.mxu0 %vm1410_vm4, %v3513_v5 }
0x1e37   :  { %v1317_v2 = vpop.permute.xlu0 %1316  ;;  %2755 = vmatprep.mubr.msk.f32.mxu0 %vm2932_vm1, %v2931_v3 }
0x1e38   :  { %vm1333_vm7 = vcmp.eq.s32.totalorder %v3488_v60, %v1317_v2 }
0x1e39   :  { %v3521_v6 = vsel %vm1333_vm7, 1.0, %v2931_v3 }
0x1e3a   :  { %2756 = vmatmul.mubr.msk.f32.gmra.mxu0 %vm1410_vm4, %v3521_v6 }
0x1e3b   :  { %v1320_v27 = vpop.permute.xlu0 %1319  ;;  %2758 = vmatprep.mubr.msk.f32.mxu0 %vm2932_vm1, %v2931_v3 }
0x1e3c   :  { %vm1334_vm5 = vcmp.eq.s32.totalorder %v3488_v60, %v1320_v27  ;;  %v3591_v27 = vld [vmem:[%s3760_s2 + $0x38] sm:$0xff] }
0x1e3d   :  { %v3529_v9 = vsel %vm1334_vm5, 1.0, %v2931_v3  ;;  %vm2392_vm11 = vcmp.gt.f32.partialorder %v3591_v27, 0.0 }
0x1e3e   :  { %2759 = vmatmul.mubr.msk.f32.gmra.mxu0 %vm1410_vm4, %v3529_v9 }
0x1e3f   :  { %v1323_v4 = vpop.permute.xlu0 %1322  ;;  %2761 = vmatprep.mubr.msk.f32.mxu0 %vm2932_vm1, %v2931_v3 }
0x1e40   :  { %vm1335_vm8 = vcmp.eq.s32.totalorder %v3488_v60, %v1323_v4  ;;  %v61_v4 = vld [vmem:[%s3761_s3 + $0x20] sm:$0xff] }
0x1e41   :  { %v3537_v11 = vsel %vm1335_vm8, 1.0, %v2931_v3 }
0x1e42   :  { %2762 = vmatmul.mubr.msk.f32.gmra.mxu0 %vm1410_vm4, %v3537_v11 }
0x1e43   :  { %v1326_v8 = vpop.permute.xlu0 %1325  ;;  %2764 = vmatprep.mubr.msk.f32.mxu0 %vm2932_vm1, %v2931_v3  ;;  %vm2306_vm1 = vcmp.eq.s32.totalorder %v2305_v48, 1 }
0x1e44   :  { %vm1336_vm9 = vcmp.eq.s32.totalorder %v3488_v60, %v1326_v8  ;;  %v62_v8 = vld [vmem:[%s3761_s3 + $0x28] sm:$0xff] }
0x1e45   :  { %v3545_v14 = vsel %vm1336_vm9, 1.0, %v2931_v3 }
0x1e46   :  { %2765 = vmatmul.mubr.msk.f32.gmra.mxu0 %vm1410_vm4, %v3545_v14 }
0x1e47   :  { %v1329_v10 = vpop.permute.xlu0 %1328 }
0x1e48   :  { %vm1337_vm10 = vcmp.eq.s32.totalorder %v3488_v60, %v1329_v10  ;;  %v58_v60 = vld [vmem:[%s3761_s3 + $0x8] sm:$0xff]  ;;  %v64_v10 = vld [vmem:[%s3761_s3 + $0x38] sm:$0xff] }
0x1e4b   :  { %v1365_v58 = vpop.permute.xlu0 %1364 }
0x1e4c   :  { %v3552_v54 = vmul.f32 %v1441_v15, %v1365_v58  ;;  %v1354_v15 = vmul.f32 %v3492_v57, %v3300_v23 }
0x1ee4   :  { %v3554_v17 = vpop.f32.mrf.mxu0 }
0x1ee6   :  { %v1146_v24 = vpop.f32.mrf.mxu0 }
0x1ee7   :  { %v1270_v37 = vadd.f32 %v3337_v43, %v1146_v24  ;;  %v1402_v24 = vmul.f32 %v1365_v58, %v1354_v15 }
0x1ee9   :  { %v3564_v44 = vadd.f32 %v3292_v19, %v1270_v37 }
0x1eeb   :  { %v2223_v30 = vadd.f32 %v3481_v49, %v3564_v44  ;;  %v3581_v49 = vsel %vm1337_vm10, 1.0, %v2931_v3  ;;  %v57_v3 = vld [vmem:[%s3761_s3] sm:$0xff] }
0x1eed   :  { %v2224_v50 = vadd.f32 %v2223_v30, %v3286_v13 }
0x1eee   :  { %v3556_v26 = vpop.f32.mrf.mxu0 }
0x1eef   :  { %v1657_v48 = vmul.f32 %v3500_v0, %v3556_v26 }
0x1ef0   :  { %v2748_v32 = vpop.f32.mrf.mxu0 }
0x1ef1   :  { %v1411_v32 = vsel %vm1410_vm4, %v1402_v24, 0.0 }
0x1ef2   :  { %v3558_v33 = vpop.f32.mrf.mxu0  ;;  %v2294_v40 = vpop.f32.mrf.mxu1 }
0x1ef3   :  { %2899 = vlog2.f32 %v2294_v40 }
0x1ef4   :  { %v2751_v34 = vpop.f32.mrf.mxu0  ;;  %v2796_v35 = vpop.f32.mrf.mxu1 }
0x1ef6   :  { %v3561_v38 = vpop.f32.mrf.mxu0 }
0x1ef8   :  { %v2754_v22 = vpop.f32.mrf.mxu0 }
0x1efa   :  { %v3566_v31 = vpop.f32.mrf.mxu0 }
0x1efc   :  { %v2757_v45 = vpop.f32.mrf.mxu0 }
0x1efd   :  { %v3634_v45 = vld [vmem:[%s3769_s11] ss:$0 sm:$0xff] }
0x1efe   :  { %v3570_v46 = vpop.f32.mrf.mxu0  ;;  %v1452_v58 = vmul.f32 %v3634_v45, %v3492_v57 }
0x1eff   :  { %v1661_v15 = vmul.f32 %v3537_v11, %v3570_v46  ;;  %v1457_v46 = vmul.f32 %v3634_v45, %v3537_v11 }
0x1f00   :  { %v2900_v47 = vpop.eup %2899  ;;  %v2760_v21 = vpop.f32.mrf.mxu0 }
0x1f01   :  { %v2299_v43 = vmul.f32 0.6931472, %v2900_v47 }
0x1f02   :  { %v3573_v51 = vpop.f32.mrf.mxu0 }
0x1f03   :  { %v2300_v53 = vadd.f32 %v2299_v43, %v2224_v50 }
0x1f04   :  { %v2763_v20 = vpop.f32.mrf.mxu0 }
0x1f05   :  { %v3576_v56 = vsel %vm2306_vm1, %v2300_v53, %v3442_v18  ;;  %v2393_v18 = vsel %vm2392_vm11, 1, %v2936_v29  ;;  %v59_v29 = vld [vmem:[%s3761_s3 + $0x10] sm:$0xff]  ;;  %v1664_v53 = vsel %vm1410_vm4, %v1657_v48, 0.0  ;;  %v1357_v20 = vmul.f32 %v3521_v6, %v3392_v36 }
0x1f06   :  { %v1653_v59 = vpop.f32.mrf.mxu0  ;;  %v2308_v63 = vsel %vm1410_vm4, %v3576_v56, -inf }
0x1f07   :  { %v3586_v1 = vmul.f32 %v3581_v49, %v1653_v59  ;;  %2309 = vmax.xlane.f32.xlu1 %v2308_v63  ;;  %v1659_v63 = vmul.f32 %v3521_v6, %v3561_v38  ;;  %v1359_v38 = vmul.f32 %v3537_v11, %v3438_v25 }
0x1f08   :  { %v2766_v2 = vpop.f32.mrf.mxu0 }
0x1f09   :  { %v1478_v2 = vpop.permute.xlu0 %1477  ;;  %v1682_v11 = vsel %vm1410_vm4, %v3586_v1, 0.0 }
0x1f18   :  { %2395 = vperm.xlu1 %2810, %v2393_v18  }
0x1f1c   :  { %1369 = vperm.xlu1 %2810, %v3316_v28  }
0x1f20   :  { %1374 = vperm.xlu1 %2810, %v3357_v12  }
0x1f24   :  { %1462 = vperm.xlu1 %2810, %v57_v3   ;;  %v1455_v3 = vmul.f32 %v3634_v45, %v3521_v6 }
0x1f28   :  { %1467 = vperm.xlu1 %2810, %v58_v60   ;;  %v1503_v60 = vmul.f32 %v1478_v2, %v1455_v3 }
0x1f2c   :  { %1379 = vperm.xlu1 %2810, %v3348_v52  }
0x1f30   :  { %1472 = vperm.xlu1 %2810, %v59_v29   ;;  %v1670_v29 = vsel %vm1410_vm4, %v1659_v63, 0.0 }
0x1f34   :  { %1384 = vperm.xlu1 %2810, %v3377_v16  }
0x1f38   :  { %1389 = vperm.xlu1 %2810, %v3400_v61  }
0x1f3c   :  { %1482 = vperm.xlu1 %2810, %v61_v4   ;;  %v1517_v4 = vsel %vm1410_vm4, %v1503_v60, 0.0 }
0x1f40   :  { %1394 = vperm.xlu1 %2810, %v3423_v39  }
0x1f44   :  { %1487 = vperm.xlu1 %2810, %v62_v8  }
0x1f48   :  { %1399 = vperm.xlu1 %2810, %v3591_v27  }
0x1f4c   :  { %1497 = vperm.xlu1 %2810, %v64_v10  }
0x1f70   :  { %1412 = vadd.xlane.f32.xlu1 %v1411_v32  ;;  %v1275_v32 = vadd.f32 %v3335_v42, %v3554_v17 }
0x1f90   :  { %v3623_v40 = vpop.xlane.xlu1 %2309 }
0x1f91   :  { %v2311_v34 = vsub.f32 %v3576_v56, %v3623_v40 }
0x1f93   :  { %v2312_v35 = vmul.f32 1.442695, %v2311_v34  ;;  %v1676_v34 = vsel %vm1410_vm4, %v1661_v15, 0.0 }
0x1f94   :  { %v3627_v37 = vpop.permute.xlu1 %2395 }
0x1f95   :  { %2901 = vpow2.f32 %v2312_v35  ;;  %v1360_v35 = vmul.f32 %v3545_v14, %v3564_v44  ;;  %vm2397_vm12 = vcmp.eq.s32.totalorder %v3627_v37, 1  ;;  %v1356_v37 = vmul.f32 %v3513_v5, %v3369_v7 }
0x1f96   :  { %v1454_v7 = vmul.f32 %v3634_v45, %v3513_v5 }
0x1f98   :  { %v3629_v22 = vpop.permute.xlu1 %1369 }
0x1f9c   :  { %v3636_v23 = vpop.permute.xlu1 %1374 }
0x1fa0   :  { %v1463_v30 = vpop.permute.xlu1 %1462 }
0x1fa1   :  { %v1500_v47 = vmul.f32 %v1463_v30, %v1452_v58  ;;  %v1292_v30 = vadd.f32 %v3292_v19, %v1275_v32 }
0x1fa2   :  { %v2902_v21 = vpop.eup %2901 }
0x1fa3   :  { %2800 = vmatmul.mubr.msk.f32.vlgmr.msra.gmra.mxu1 %vm1410_vm4, %v2902_v21  ;;  %v1508_v50 = vsel %vm1410_vm4, %v1500_v47, 0.0  ;;  %v1361_v42 = vmul.f32 %v3581_v49, %v1292_v30 }
0x1fa4   :  { %1509 = vadd.xlane.f32.xlu1 %v1508_v50  ;;  %v3644_v43 = vpop.permute.xlu1 %1467 }
0x1fa8   :  { %1665 = vadd.xlane.f32.xlu1 %v1664_v53  ;;  %v1380_v57 = vpop.permute.xlu1 %1379 }
0x1fa9   :  { %v1405_v59 = vmul.f32 %v1380_v57, %v1357_v20  ;;  %v1459_v20 = vmul.f32 %v3634_v45, %v3581_v49 }
0x1fab   :  { %v1420_v26 = vsel %vm1410_vm4, %v1405_v59, 0.0 }
0x1fac   :  { %1421 = vadd.xlane.f32.xlu1 %v1420_v26  ;;  %v3652_v18 = vpop.permute.xlu1 %1472  ;;  %v2314_v26 = vadd.f32 %v3623_v40, %v1292_v30  ;;  %v1355_v40 = vmul.f32 %v3500_v0, %v3340_v55  ;;  %v1658_v55 = vmul.f32 %v3513_v5, %v3558_v33  ;;  %v1660_v33 = vmul.f32 %v3529_v9, %v3566_v31 }
0x1fad   :  { %v1456_v5 = vmul.f32 %v3634_v45, %v3529_v9 }
0x1fae   :  { %v2315_v3 = vadd.f32 %v2314_v26, %v3286_v13  ;;  %v1403_v13 = vmul.f32 %v3629_v22, %v1355_v40  ;;  %v1667_v32 = vsel %vm1410_vm4, %v1658_v55, 0.0 }
0x1fb0   :  { %1671 = vadd.xlane.f32.xlu1 %v1670_v29  ;;  %v3657_v36 = vpop.permute.xlu1 %1384 }
0x1fb4   :  { %1518 = vadd.xlane.f32.xlu1 %v1517_v4  ;;  %v1390_v8 = vpop.permute.xlu1 %1389 }
0x1fb5   :  { %v1407_v10 = vmul.f32 %v1390_v8, %v1359_v38  ;;  %v63_v38 = vld [vmem:[%s3761_s3 + $0x30] sm:$0xff]  ;;  %v1414_v8 = vsel %vm1410_vm4, %v1403_v13, 0.0  ;;  %s2937_s3 = smov [#allocation2]  }
0x1fb6   :  { %s2429_s28 = sshll.u32 %s2937_s3, 4  ;;  %s2430_s28 = int_to_ptr.vmem [resolvable:$true] %s2429_s28 }
0x1fb7   :  { %v1426_v24 = vsel %vm1410_vm4, %v1407_v10, 0.0  ;;  %v1453_v10 = vmul.f32 %v3634_v45, %v3500_v0  ;;  %v1358_v0 = vmul.f32 %v3529_v9, %v3415_v62  ;;  %v1662_v9 = vmul.f32 %v3545_v14, %v3573_v51  ;;  %s2909_s6 = scalar_lea.vmem %s2430_s28, 16  ;;  %s2913_s30 = scalar_lea.vmem %s2430_s28, 32 }
0x1fb8   :  { %1427 = vadd.xlane.f32.xlu1 %v1426_v24  ;;  %v3665_v6 = vpop.permute.xlu1 %1482  ;;  %p2910_p0 = scmp.ne.s32.totalorder %s2430_s28, %s2909_s6  ;;  %p2914_p1 = scmp.lt.s32.totalorder %s2430_s28, %s2430_s28 }
0x1fb9   :  { %v1501_v15 = vmul.f32 %v3644_v43, %v1453_v10  ;;  %v1406_v43 = vmul.f32 %v3657_v36, %v1358_v0  ;;  %p2915_p2 = scmp.lt.s32.totalorder %s2913_s30, %s2909_s6 }
0x1fbb   :  { %v1511_v22 = vsel %vm1410_vm4, %v1501_v15, 0.0  ;;  %p2916_p3 = por %p2915_p2, %p2914_p1 }
0x1fbc   :  { %1677 = vadd.xlane.f32.xlu1 %v1676_v34  ;;  %v1395_v25 = vpop.permute.xlu1 %1394 }
0x1fbd   :  { %v3672_v58 = vmul.f32 %v1395_v25, %v1360_v35  ;;  %v1423_v35 = vsel %vm1410_vm4, %v1406_v43, 0.0  ;;  %v1673_v25 = vsel %vm1410_vm4, %v1660_v33, 0.0  ;;  %p2917_p4 = pnand %p2916_p3, %p2910_p0 }
0x1fc0   :  { %v1488_v47 = vpop.permute.xlu1 %1487 }
0x1fc1   :  { %v1505_v21 = vmul.f32 %v1488_v47, %v1457_v46 }
0x1fc3   :  { %v1523_v48 = vsel %vm1410_vm4, %v1505_v21, 0.0 }
0x1fc4   :  { %1524 = vadd.xlane.f32.xlu1 %v1523_v48  ;;  %v1400_v17 = vpop.permute.xlu1 %1399  ;;  %v1458_v48 = vmul.f32 %v3634_v45, %v3545_v14 }
0x1fc5   :  { %v1409_v50 = vmul.f32 %v1400_v17, %v1361_v42  ;;  %v1679_v17 = vsel %vm1410_vm4, %v1662_v9, 0.0 }
0x1fc7   :  { %v1432_v44 = vsel %vm1410_vm4, %v1409_v50, 0.0 }
0x1fc8   :  { %1433 = vadd.xlane.f32.xlu1 %v1432_v44  ;;  %v1498_v53 = vpop.permute.xlu1 %1497  ;;  %v1443_v44 = vsel %vm1410_vm4, %v3552_v54, 0.0 }
0x1fc9   :  { %v1507_v19 = vmul.f32 %v1498_v53, %v1459_v20 }
0x1fcb   :  { %v1529_v57 = vsel %vm1410_vm4, %v1507_v19, 0.0 }
0x1fcc   :  { %1683 = vadd.xlane.f32.xlu1 %v1682_v11 }
0x1fd0   :  { %1530 = vadd.xlane.f32.xlu1 %v1529_v57 }
0x1ff9   :  { %v1413_v51 = vpop.xlane.xlu1 %1412 }
0x202d   :  { %v1510_v53 = vpop.xlane.xlu1 %1509 }
0x2063   :  { %v2385_v59 = vpop.f32.mrf.mxu1 }
0x2064   :  { %2903 = vlog2.f32 %v2385_v59 }
0x2065   :  { %v2801_v63 = vpop.f32.mrf.mxu1 }
0x2071   :  { %v2904_v2 = vpop.eup %2903 }
0x2072   :  { %v2390_v60 = vmul.f32 0.6931472, %v2904_v2 }
0x2074   :  { %v2391_v29 = vadd.f32 %v2390_v60, %v2315_v3 }
0x2076   :  { %v2398_v49 = vsel %vm2397_vm12, %v2391_v29, %v3576_v56  ;;  %v1404_v56 = vmul.f32 %v3636_v23, %v1356_v37  ;;  %v1502_v23 = vmul.f32 %v3652_v18, %v1454_v7  ;;  %v1504_v18 = vmul.f32 %v3665_v6, %v1456_v5 }
0x2077   :  { %v2399_v1 = vadd.f32 %v3634_v45, %v2398_v49  ;;  %v1429_v6 = vsel %vm1410_vm4, %v3672_v58, 0.0  ;;  %v1666_v58 = vpop.xlane.xlu1 %1665 }
0x2078   :  { %v1417_v24 = vsel %vm1410_vm4, %v1404_v56, 0.0  ;;  %v1514_v34 = vsel %vm1410_vm4, %v1502_v23, 0.0  ;;  %v1520_v62 = vsel %vm1410_vm4, %v1504_v18, 0.0 }
0x2079   :  { %v2400_v4 = vsel %vm1410_vm4, %v2399_v1, -inf }
0x207a   :  { %2401 = vmax.xlane.f32.xlu0 %v2400_v4 }
0x207b   :  { %v1422_v11 = vpop.xlane.xlu1 %1421 }
0x207f   :  { %v1672_v59 = vpop.xlane.xlu1 %1671 }
0x2080   :  { %v1687_v56 = vmul.f32 %v1672_v59, %v3348_v52 }
0x2083   :  { %v1519_v45 = vpop.xlane.xlu1 %1518 }
0x2087   :  { %v1428_v26 = vpop.xlane.xlu1 %1427 }
0x208b   :  { %v1678_v3 = vpop.xlane.xlu1 %1677 }
0x208c   :  { %v1689_v43 = vmul.f32 %v1678_v3, %v3400_v61 }
0x208f   :  { %v1525_v4 = vpop.xlane.xlu1 %1524 }
0x2090   :  { %1492 = vperm.xlu0 %2809, %v63_v38  }
0x20af   :  { %1415 = vadd.xlane.f32.xlu0 %v1414_v8 }
0x20b3   :  { %1418 = vadd.xlane.f32.xlu0 %v1417_v24  ;;  %v1434_v24 = vpop.xlane.xlu1 %1433 }
0x20b7   :  { %1512 = vadd.xlane.f32.xlu0 %v1511_v22  ;;  %v1684_v33 = vpop.xlane.xlu1 %1683 }
0x20bb   :  { %1668 = vadd.xlane.f32.xlu0 %v1667_v32 }
0x20bf   :  { %1515 = vadd.xlane.f32.xlu0 %v1514_v34 }
0x20c3   :  { %1424 = vadd.xlane.f32.xlu0 %v1423_v35 }
0x20c7   :  { %1674 = vadd.xlane.f32.xlu0 %v1673_v25 }
0x20cb   :  { %1521 = vadd.xlane.f32.xlu0 %v1520_v62  ;;  %v1691_v62 = vmul.f32 %v1684_v33, %v3591_v27 }
0x2103   :  { %v3724_v36 = vpop.xlane.xlu0 %2401 }
0x2104   :  { %v2403_v30 = vsub.f32 %v2399_v1, %v3724_v36  ;;  %v1685_v1 = vmul.f32 %v1666_v58, %v3316_v28 }
0x2106   :  { %v2404_v46 = vmul.f32 1.442695, %v2403_v30 }
0x2108   :  { %2905 = vpow2.f32 %v2404_v46 }
0x210b   :  { %v1493_v21 = vpop.permute.xlu0 %1492 }
0x210c   :  { %v1506_v42 = vmul.f32 %v1493_v21, %v1458_v48 }
0x210e   :  { %v1526_v50 = vsel %vm1410_vm4, %v1506_v42, 0.0 }
0x2115   :  { %v2906_v31 = vpop.eup %2905 }
0x2116   :  { %v2406_v47 = vsel %vm1410_vm4, %v2906_v31, 0.0  ;;  %vm1726_vm4 = vcmask 7168  }
0x2117   :  { %2407 = vadd.xlane.f32.xlu0 %v2406_v47  ;;  %v1727_v37 = vsel %vm1726_vm4, %v1685_v1, 0.0  ;;  %v1730_v28 = vsel %vm1726_vm4, %v1687_v56, 0.0  ;;  %v1734_v25 = vsel %vm1726_vm4, %v1689_v43, 0.0  ;;  %v1738_v48 = vsel %vm1726_vm4, %v1691_v62, 0.0 }
0x211b   :  { %1430 = vadd.xlane.f32.xlu0 %v1429_v6 }
0x211f   :  { %1680 = vadd.xlane.f32.xlu0 %v1679_v17 }
0x2123   :  { %1527 = vadd.xlane.f32.xlu0 %v1526_v50  ;;  %v1531_v50 = vpop.xlane.xlu1 %1530 }
0x2127   :  { %1444 = vadd.xlane.f32.xlu0 %v1443_v44 }
0x2138   :  { %v1416_v20 = vpop.xlane.xlu0 %1415 }
0x2139   :  { %v1692_v29 = vadd.f32 %v1416_v20, %v1413_v51 }
0x213c   :  { %v1419_v19 = vpop.xlane.xlu0 %1418 }
0x213d   :  { %v1693_v49 = vadd.f32 %v1692_v29, %v1419_v19 }
0x213f   :  { %v1694_v13 = vadd.f32 %v1693_v49, %v1422_v11 }
0x2140   :  { %v1513_v57 = vpop.xlane.xlu0 %1512 }
0x2141   :  { %v1712_v8 = vadd.f32 %v1513_v57, %v1510_v53 }
0x2144   :  { %v1669_v14 = vpop.xlane.xlu0 %1668 }
0x2145   :  { %v1686_v54 = vmul.f32 %v1669_v14, %v3357_v12 }
0x2147   :  { %v1728_v40 = vsel %vm1726_vm4, %v1686_v54, 0.0 }
0x2148   :  { %v1516_v63 = vpop.xlane.xlu0 %1515  ;;  %v1729_v55 = vadd.f32 %v1728_v40, %v1727_v37 }
0x2149   :  { %v1713_v12 = vadd.f32 %v1712_v8, %v1516_v63 }
0x214a   :  { %v1731_v32 = vadd.f32 %v1730_v28, %v1729_v55 }
0x214b   :  { %v1714_v34 = vadd.f32 %v1713_v12, %v1519_v45 }
0x214c   :  { %v1425_v2 = vpop.xlane.xlu0 %1424 }
0x214d   :  { %v1695_v10 = vadd.f32 %v1694_v13, %v1425_v2 }
0x214f   :  { %v1696_v23 = vadd.f32 %v1695_v10, %v1428_v26 }
0x2150   :  { %v1675_v60 = vpop.xlane.xlu0 %1674 }
0x2151   :  { %v1688_v15 = vmul.f32 %v1675_v60, %v3377_v16 }
0x2153   :  { %v1732_v7 = vsel %vm1726_vm4, %v1688_v15, 0.0 }
0x2154   :  { %v1522_v38 = vpop.xlane.xlu0 %1521  ;;  %v1733_v35 = vadd.f32 %v1732_v7, %v1731_v32 }
0x2155   :  { %v1715_v5 = vadd.f32 %v1714_v34, %v1522_v38 }
0x2156   :  { %v1735_v31 = vadd.f32 %v1734_v25, %v1733_v35 }
0x2157   :  { %v1716_v6 = vadd.f32 %v1715_v5, %v1525_v4 }
0x21a0   :  { %v2408_v22 = vpop.xlane.xlu0 %2407 }
0x21a1   :  { %2907 = vlog2.f32 %v2408_v22 }
0x21a4   :  { %v1431_v0 = vpop.xlane.xlu0 %1430 }
0x21a5   :  { %v1697_v52 = vadd.f32 %v1696_v23, %v1431_v0 }
0x21a7   :  { %v1698_v16 = vadd.f32 %v1697_v52, %v1434_v24 }
0x21a8   :  { %v1681_v18 = vpop.xlane.xlu0 %1680 }
0x21a9   :  { %v1699_v30 = vrot.slane %v1698_v16, 4  ;;  %v1690_v46 = vmul.f32 %v1681_v18, %v3423_v39 }
0x21ab   :  { %v1700_v47 = vadd.f32 %v1699_v30, %v1698_v16  ;;  %v1736_v9 = vsel %vm1726_vm4, %v1690_v46, 0.0 }
0x21ac   :  { %v1737_v61 = vadd.f32 %v1736_v9, %v1735_v31  ;;  %v1528_v21 = vpop.xlane.xlu0 %1527 }
0x21ad   :  { %v1717_v42 = vadd.f32 %v1716_v6, %v1528_v21  ;;  %v1701_v53 = vrot.slane %v1700_v47, 2 }
0x21ae   :  { %v2908_v17 = vpop.eup %2907  ;;  %v1739_v44 = vadd.f32 %v1738_v48, %v1737_v61 }
0x21af   :  { %v2410_v51 = vmul.f32 0.6931472, %v2908_v17  ;;  %v1718_v20 = vadd.f32 %v1717_v42, %v1531_v50  ;;  %v1702_v14 = vadd.f32 %v1701_v53, %v1700_v47 }
0x21b0   :  { %v1740_v27 = vrot.slane %v1739_v44, 4  ;;  %v1445_v58 = vpop.xlane.xlu0 %1444 }
0x21b1   :  { %v2411_v39 = vadd.f32 %v2410_v51, %v3724_v36  ;;  %v1719_v19 = vrot.slane %v1718_v20, 4  ;;  %v1705_v11 = vrot.slane %v1445_v58, 4  ;;  %v1703_v49 = vrot.slane %v1702_v14, 1 }
0x21b2   :  { %v1741_v57 = vadd.f32 %v1740_v27, %v1739_v44 }
0x21b3   :  { %v2412_v59 = vmul.f32 %v2411_v39, %v3475_v41  ;;  %v1720_v45 = vadd.f32 %v1719_v19, %v1718_v20  ;;  %v1706_v63 = vadd.f32 %v1705_v11, %v1445_v58  ;;  %v1704_v37 = vadd.f32 %v1703_v49, %v1702_v14 }
0x21b4   :  { %v1742_v26 = vrot.slane %v1741_v57, 2 }
0x21b5   :  { %v2413_v2 = vsel %vm1726_vm4, %v2412_v59, 0.0  ;;  %v1721_v3 = vrot.slane %v1720_v45, 2  ;;  %v1707_v60 = vrot.slane %v1706_v63, 2 }
0x21b6   :  { %v2414_v29 = vrot.slane %v2413_v2, 4  ;;  %v1743_v54 = vadd.f32 %v1742_v26, %v1741_v57 }
0x21b7   :  { %v1722_v1 = vadd.f32 %v1721_v3, %v1720_v45  ;;  %v1708_v4 = vadd.f32 %v1707_v60, %v1706_v63 }
0x21b8   :  { %v2415_v38 = vadd.f32 %v2414_v29, %v2413_v2  ;;  %v1744_v41 = vrot.slane %v1743_v54, 1 }
0x21b9   :  { %v1723_v36 = vrot.slane %v1722_v1, 1  ;;  %v1709_v40 = vrot.slane %v1708_v4, 1 }
0x21ba   :  { %v2416_v13 = vrot.slane %v2415_v38, 2  ;;  %v1745_v22 = vadd.f32 %v1744_v41, %v1743_v54 }
0x21bb   :  { %v1710_v56 = vadd.f32 %v1709_v40, %v1708_v4  ;;  %v1724_v10 = vadd.f32 %v1723_v36, %v1722_v1 }
0x21bc   :  { %v2417_v8 = vadd.f32 %v2416_v13, %v2415_v38 }
0x21bd   :  { %v1711_v15 = vadd.f32 %v1710_v56, %v1704_v37 }
0x21be   :  { %v2418_v24 = vrot.slane %v2417_v8, 1 }
0x21bf   :  { %v1725_v55 = vadd.f32 %v1724_v10, %v1711_v15 }
0x21c0   :  { %v2419_v12 = vadd.f32 %v2418_v24, %v2417_v8 }
0x21c1   :  { %v1746_v28 = vadd.f32 %v1745_v22, %v1725_v55 }
0x21c3   :  { %v2420_v7 = vsub.f32 %v2419_v12, %v1746_v28 }
0x21c5   :  { %2422 = vst.msk [vmem:[#allocation2] sm:$0x1] %vm2421_vm13, %v2420_v7 }
0x21c6   :  { %2920 = shalt.err (!%p2917_p4)
}
0x21c7   :  { %2432 = dma.vmem_to_hbm [thread:$0]  %s2430_s28, 16, %s3771_s13, [#allocation3]  }
0x21c8   :  { %2929 = dma.done.wait [#allocation3], 16  }
0x21c9   :  { %2930 = vsyncadd [#allocation3], 4294967280 }
0x21ca   :  { %2436 = vsyncpa [#allocation3], 1 }

</bundles_post_ra>
